<compile_context>
chip_gen: v7x
topology: tpu7x:2x2x1
jax: 0.10.0
libtpu: 0.0.40
codegen_flags: <defaults>
</compile_context>

<pallas_src>
import jax
import jax.numpy as jnp
from jax import lax
from jax.experimental import pallas as pl
from jax.experimental.pallas import tpu as pltpu

# ---- small synthetic config (stand-in for the frozen 5120-dim LLM) ----------
VOCAB = 64
SEQ = 14             # the module hard-codes a 14-token sequence (14 * 5120 features)
D = 32               # hidden size (stand-in for 5120)
H = 4                # attention heads
HD = D // H          # head dim
HHD = H * HD         # = D, concatenated-heads width
QKV_PAD = 128        # fused q|k|v output width, padded 96 -> 128 lanes
F = 64               # MLP intermediate size
GU = 2 * F           # fused gate|up width (= 128 lanes)
NUM_UNITS = 2        # stand-in for num_units=10 decoder layers
NUM_CLASSES = 5
C_PAD = 128          # lane-dense padded class dim for the head output
BATCH = 2
EPS = 1e-6
NEG = -1e30
SCALE = 1.0 / (HD ** 0.5)


# ---------------- fused decoder-stack + classifier-head kernel ---------------
def decoder_stack_kernel(x_ref, rms1_ref, wqkv_ref, wo_ref, rms2_ref,
                         wgu_ref, wd_ref, hw_ref, hb_ref,
                         o_ref, probs_ref, ctx_scr):
    """One grid step == one decoder layer applied to the resident activations.

    x_ref:    (B*S, D) f32   initial embeddings (read only at layer 0)
    rms*_ref: (1, D)  f32    RMSNorm scales of this layer
    wqkv_ref: (D, 128) bf16  fused q|k|v projection (zero-padded lanes 96..127)
    wo_ref:   (H*HD, D) bf16 attention output projection
    wgu_ref:  (D, 2F) bf16   fused gate|up
    wd_ref:   (F, D)  bf16   down projection
    hw_ref:   (S, D, 128) bf16  classifier weight, per token position
    hb_ref:   (1, 128) f32   classifier bias (-1e30 on padded classes)
    o_ref:    (B*S, D) f32   activations, resident in VMEM across the layer axis
    probs_ref:(B, 128) f32   class probabilities, written on the last layer only
    ctx_scr:  (B*S, H*HD) f32 VMEM scratch assembling per-head attention contexts
    """
    l = pl.program_id(0)
    nl = pl.num_programs(0)

    @pl.when(l == 0)
    def _init():
        o_ref[...] = x_ref[...]

    x = o_ref[...]                                          # (BS, D) f32
    bs = x.shape[0]
    n_batch = probs_ref.shape[0]

    # ---- RMSNorm (pre-attention) ----
    var = jnp.mean(x * x, axis=-1, keepdims=True)
    h = (x * lax.rsqrt(var + EPS) * rms1_ref[...]).astype(jnp.bfloat16)

    # ---- fused QKV projection: one lane-dense matmul, f32 accumulation ----
    qkv = jnp.dot(h, wqkv_ref[...], preferred_element_type=jnp.float32)  # (BS, 128)
    q = (qkv[:, 0:HHD] * SCALE).astype(jnp.bfloat16)        # (BS, HHD)
    k = qkv[:, HHD:2 * HHD].astype(jnp.bfloat16)
    v = qkv[:, 2 * HHD:3 * HHD].astype(jnp.bfloat16)

    # ---- block-diagonal causal additive bias, built in-kernel (no HBM mask) ----
    # token index t = b*S + s; t may attend to t' iff same batch block & t' <= t.
    row = lax.broadcasted_iota(jnp.int32, (bs, bs), 0)
    col = lax.broadcasted_iota(jnp.int32, (bs, bs), 1)
    allowed = col <= row
    for b in range(1, bs // SEQ):                           # no vector int div/mod
        m = b * SEQ
        same_side = ((row < m) & (col < m)) | ((row >= m) & (col >= m))
        allowed = allowed & same_side
    bias = jnp.where(allowed, 0.0, NEG).astype(jnp.float32)

    # ---- multi-head causal self-attention; heads via static lane slices ----
    # TODO(synk): rotary position embeddings of the pretrained layer omitted
    # (frozen-LLM internals are synthetic here).
    for hd_i in range(H):
        sl = slice(hd_i * HD, (hd_i + 1) * HD)
        qh, kh, vh = q[:, sl], k[:, sl], v[:, sl]           # (BS, HD) bf16
        # q @ k.T by contracting last dims (no explicit transpose)
        s = lax.dot_general(qh, kh, (((1,), (1,)), ((), ())),
                            preferred_element_type=jnp.float32)   # (BS, BS)
        s = s + bias
        mx = jnp.max(s, axis=-1, keepdims=True)
        e = jnp.exp(s - mx)
        p = e * pl.reciprocal(jnp.sum(e, axis=-1, keepdims=True), approx=True)
        ctx = jnp.dot(p.astype(jnp.bfloat16), vh,
                      preferred_element_type=jnp.float32)         # (BS, HD)
        ctx_scr[:, sl] = ctx                                      # assemble (BS, H*HD)

    # single full-K output projection: (BS, H*HD) @ (H*HD, D)
    attn = jnp.dot(ctx_scr[...].astype(jnp.bfloat16), wo_ref[...],
                   preferred_element_type=jnp.float32)
    x = x + attn

    # ---- RMSNorm (pre-MLP) + fused gate|up SwiGLU ----
    var2 = jnp.mean(x * x, axis=-1, keepdims=True)
    h2 = (x * lax.rsqrt(var2 + EPS) * rms2_ref[...]).astype(jnp.bfloat16)
    gu = jnp.dot(h2, wgu_ref[...], preferred_element_type=jnp.float32)   # (BS, 2F)
    g = gu[:, :F]
    u = gu[:, F:]
    act = (g * jax.nn.sigmoid(g) * u).astype(jnp.bfloat16)
    x = x + jnp.dot(act, wd_ref[...], preferred_element_type=jnp.float32)

    o_ref[...] = x

    # ---- fused classifier head on the last layer (no second pallas_call) ----
    @pl.when(l == nl - 1)
    def _head():
        xb = x.astype(jnp.bfloat16)                         # (BS, D)
        # torch.flatten(start_dim=1) + Linear expressed as a sum of per-token
        # matmuls: logits[b] = bias + sum_s x[b*S+s] @ W[s]  (no in-kernel reshape)
        logit_rows = [hb_ref[...] for _ in range(n_batch)]  # (1, C_PAD) f32 each
        for s_i in range(SEQ):
            contrib = jnp.dot(xb, hw_ref[s_i],
                              preferred_element_type=jnp.float32)   # (BS, C_PAD)
            for b in range(n_batch):
                r = b * SEQ + s_i
                logit_rows[b] = logit_rows[b] + contrib[r:r + 1, :]
        for b in range(n_batch):
            lg = logit_rows[b]
            mh = jnp.max(lg, axis=-1, keepdims=True)
            eh = jnp.exp(lg - mh)
            # exact divide in the head for torch.softmax parity
            probs_ref[b:b + 1, :] = eh / jnp.sum(eh, axis=-1, keepdims=True)


def decoder_stack_and_head(x2, p):
    """x2: (B*S, D) f32 -> ((B*S, D) f32 final latents, (B, C_PAD) f32 probs)."""
    bs = x2.shape[0]
    batch = bs // SEQ
    num_layers = p["wqkv"].shape[0]

    def whole(shape):
        nd = len(shape)
        return pl.BlockSpec(shape, lambda l, _nd=nd: (0,) * _nd)

    def per_layer(tail):
        nd = len(tail)
        return pl.BlockSpec((None,) + tail, lambda l, _nd=nd: (l,) + (0,) * _nd)

    in_specs = [
        whole((bs, D)),               # x (embeddings, read at layer 0 only)
        per_layer((1, D)),            # rms1
        per_layer((D, QKV_PAD)),      # fused q|k|v
        per_layer((HHD, D)),          # wo
        per_layer((1, D)),            # rms2
        per_layer((D, GU)),           # fused gate|up
        per_layer((F, D)),            # w_down
        whole((SEQ, D, C_PAD)),       # classifier weight (resident)
        whole((1, C_PAD)),            # classifier bias
    ]
    out_specs = (
        whole((bs, D)),               # resident activation accumulator
        whole((batch, C_PAD)),        # lane-dense probabilities (last layer)
    )

    # TODO(synk): on v7x add a leading "parallel" batch grid axis (attention is
    # block-diagonal per batch element) so the second TensorCore is used.
    return pl.pallas_call(
        decoder_stack_kernel,
        out_shape=(jax.ShapeDtypeStruct((bs, D), jnp.float32),
                   jax.ShapeDtypeStruct((batch, C_PAD), jnp.float32)),
        grid=(num_layers,),
        in_specs=in_specs,
        out_specs=out_specs,
        scratch_shapes=[pltpu.VMEM((bs, HHD), jnp.float32)],
        compiler_params=pltpu.CompilerParams(
            dimension_semantics=("arbitrary",)),   # layer axis is sequential
    )(x2, p["rms1"], p["wqkv"], p["wo"], p["rms2"], p["wgu"], p["wd"],
      p["head_w"], p["head_b"])


# ----------------------------- parameter construction ------------------------
def init_params(key):
    ks = jax.random.split(key, 8)

    def bf16(k, shape, scale=0.05):
        return (scale * jax.random.normal(k, shape, jnp.float32)).astype(jnp.bfloat16)

    params = {}
    params["embed"] = 0.02 * jax.random.normal(ks[0], (VOCAB, D), jnp.float32)

    # Per-layer weights stacked on a leading layer axis, q|k|v and gate|up fused
    # into single lane-dense matrices; bf16 streaming dtype (f32 RMS scales).
    params["rms1"] = jnp.ones((NUM_UNITS, 1, D), jnp.float32)
    params["rms2"] = jnp.ones((NUM_UNITS, 1, D), jnp.float32)

    wqkv_real = 0.05 * jax.random.normal(ks[1], (NUM_UNITS, D, 3 * HHD), jnp.float32)
    wqkv = jnp.zeros((NUM_UNITS, D, QKV_PAD), jnp.float32)
    wqkv = wqkv.at[:, :, :3 * HHD].set(wqkv_real)
    params["wqkv"] = wqkv.astype(jnp.bfloat16)

    params["wo"] = bf16(ks[2], (NUM_UNITS, HHD, D))
    params["wgu"] = bf16(ks[3], (NUM_UNITS, D, GU))      # gate | up fused (2F = 128)
    params["wd"] = bf16(ks[4], (NUM_UNITS, F, D))

    # Classifier head: stored per token position (S, D, C_PAD) so the fused
    # in-kernel head indexes hw[s]; zero-padded classes get a -1e30 bias so
    # their softmax probability is exactly 0.
    hw_real = 0.02 * jax.random.normal(ks[5], (SEQ, D, NUM_CLASSES), jnp.float32)
    hw = jnp.zeros((SEQ, D, C_PAD), jnp.float32).at[:, :, :NUM_CLASSES].set(hw_real)
    params["head_w"] = hw.astype(jnp.bfloat16)
    params["head_b"] = jnp.full((1, C_PAD), NEG, jnp.float32).at[0, :NUM_CLASSES].set(0.0)
    return params


# ----------------------------- forward (module equivalent) -------------------
@jax.jit
def classifier_forward(input_ids, params):
    # TODO(synk): HF tokenizer has no Pallas/JAX equivalent; input is
    # pre-tokenized ids.  Embedding lookup (a gather) stays in plain JAX.
    batch = input_ids.shape[0]
    latents = jnp.take(params["embed"], input_ids, axis=0)   # (B, S, D) f32
    x2 = latents.reshape(batch * SEQ, D)                      # batch folded into sublanes

    _, probs_pad = decoder_stack_and_head(x2, params)         # head fused in-kernel
    return probs_pad[:, :NUM_CLASSES]                         # (B, num_classes)


if __name__ == "__main__":
    key = jax.random.PRNGKey(0)
    pkey, dkey = jax.random.split(key)
    params = init_params(pkey)
    input_ids = jax.random.randint(dkey, (BATCH, SEQ), 0, VOCAB, dtype=jnp.int32)

    out = classifier_forward(input_ids, params)
    out = jax.block_until_ready(out)

    assert out.shape == (BATCH, NUM_CLASSES)
    assert bool(jnp.all(jnp.isfinite(out)))
    # head softmax uses an exact divide -> rows sum to 1 within f32 rounding
    assert bool(jnp.all(jnp.abs(jnp.sum(out, axis=-1) - 1.0) < 1e-3))
    print("KERNEL_OK")
</pallas_src>

<mosaic_0001>
module attributes {stable_mosaic.version = 11 : i64} {
  func.func @decoder_stack_kernel(%arg0: i32, %arg1: memref<28x32xf32, #tpu.memory_space<vmem>>, %arg2: memref<1x1x32xf32, #tpu.memory_space<vmem>>, %arg3: memref<1x32x128xbf16, #tpu.memory_space<vmem>>, %arg4: memref<1x32x32xbf16, #tpu.memory_space<vmem>>, %arg5: memref<1x1x32xf32, #tpu.memory_space<vmem>>, %arg6: memref<1x32x128xbf16, #tpu.memory_space<vmem>>, %arg7: memref<1x64x32xbf16, #tpu.memory_space<vmem>>, %arg8: memref<14x32x128xbf16, #tpu.memory_space<vmem>>, %arg9: memref<1x128xf32, #tpu.memory_space<vmem>>, %arg10: memref<28x32xf32, #tpu.memory_space<vmem>>, %arg11: memref<2x128xf32, #tpu.memory_space<vmem>>, %arg12: memref<28x32xf32, #tpu.memory_space<vmem>>) attributes {dimension_semantics = [#tpu.dimension_semantics<arbitrary>], iteration_bounds = array<i64: 2>, scalar_prefetch = 0 : i64, scratch_operands = 1 : i64, tpu.core_type = #tpu.core_type<tc>, window_params = [{pipeline_mode = #tpu.pipeline_mode<synchronous>, transform_indices = @transform_0, window_bounds = array<i64: 28, 32>}, {transform_indices = @transform_1, window_bounds = array<i64: 1, 1, 32>}, {transform_indices = @transform_2, window_bounds = array<i64: 1, 32, 128>}, {transform_indices = @transform_3, window_bounds = array<i64: 1, 32, 32>}, {transform_indices = @transform_4, window_bounds = array<i64: 1, 1, 32>}, {transform_indices = @transform_5, window_bounds = array<i64: 1, 32, 128>}, {transform_indices = @transform_6, window_bounds = array<i64: 1, 64, 32>}, {pipeline_mode = #tpu.pipeline_mode<synchronous>, transform_indices = @transform_7, window_bounds = array<i64: 14, 32, 128>}, {pipeline_mode = #tpu.pipeline_mode<synchronous>, transform_indices = @transform_8, window_bounds = array<i64: 1, 128>}, {pipeline_mode = #tpu.pipeline_mode<synchronous>, transform_indices = @transform_9, window_bounds = array<i64: 28, 32>}, {pipeline_mode = #tpu.pipeline_mode<synchronous>, transform_indices = @transform_10, window_bounds = array<i64: 2, 128>}]} {
    %c0_i32 = arith.constant 0 : i32
    %0 = arith.cmpi eq, %arg0, %c0_i32 : i32
    %1 = arith.extui %0 : i1 to i32
    %c0_i32_0 = arith.constant 0 : i32
    %2 = arith.cmpi ne, %1, %c0_i32_0 : i32
    scf.if %2 {
      %c0_62 = arith.constant 0 : index
      %c0_63 = arith.constant 0 : index
      %162 = vector.load %arg1[%c0_62, %c0_63] : memref<28x32xf32, #tpu.memory_space<vmem>>, vector<28x32xf32>
      %c0_64 = arith.constant 0 : index
      %c0_65 = arith.constant 0 : index
      %163 = vector.load %arg10[%c0_64, %c0_65] : memref<28x32xf32, #tpu.memory_space<vmem>>, vector<28x32xf32>
      tpu.vector_store %arg10[%c0_64, %c0_65], %162 {strides = array<i32>} : memref<28x32xf32, #tpu.memory_space<vmem>>, vector<28x32xf32>,
    } else {
    }
    %c0 = arith.constant 0 : index
    %c0_1 = arith.constant 0 : index
    %3 = vector.load %arg10[%c0, %c0_1] : memref<28x32xf32, #tpu.memory_space<vmem>>, vector<28x32xf32>
    %4 = arith.mulf %3, %3 : vector<28x32xf32>
    %cst = arith.constant dense<0.000000e+00> : vector<28xf32>
    %5 = vector.multi_reduction <add>, %4, %cst [1] : vector<28x32xf32> to vector<28xf32>
    %6 = vector.shape_cast %5 : vector<28xf32> to vector<28x1xf32>
    %cst_2 = arith.constant 3.200000e+01 : f32
    %7 = vector.broadcast %cst_2 : f32 to vector<28x1xf32>
    %8 = arith.divf %6, %7 : vector<28x1xf32>
    %cst_3 = arith.constant 9.99999997E-7 : f32
    %9 = vector.broadcast %cst_3 : f32 to vector<28x1xf32>
    %10 = arith.addf %8, %9 : vector<28x1xf32>
    %11 = math.rsqrt %10 : vector<28x1xf32>
    %12 = vector.broadcast %11 : vector<28x1xf32> to vector<28x32xf32>
    %13 = arith.mulf %3, %12 : vector<28x32xf32>
    %c0_4 = arith.constant 0 : index
    %c0_5 = arith.constant 0 : index
    %c0_6 = arith.constant 0 : index
    %14 = vector.load %arg2[%c0_4, %c0_5, %c0_6] : memref<1x1x32xf32, #tpu.memory_space<vmem>>, vector<1x1x32xf32>
    %15 = vector.shape_cast %14 : vector<1x1x32xf32> to vector<1x32xf32>
    %16 = vector.broadcast %15 : vector<1x32xf32> to vector<28x32xf32>
    %17 = arith.mulf %13, %16 : vector<28x32xf32>
    %18 = arith.truncf %17 : vector<28x32xf32> to vector<28x32xbf16>
    %c0_7 = arith.constant 0 : index
    %c0_8 = arith.constant 0 : index
    %c0_9 = arith.constant 0 : index
    %19 = vector.load %arg3[%c0_7, %c0_8, %c0_9] : memref<1x32x128xbf16, #tpu.memory_space<vmem>>, vector<1x32x128xbf16>
    %20 = vector.shape_cast %19 : vector<1x32x128xbf16> to vector<32x128xbf16>
    %cst_10 = arith.constant dense<0.000000e+00> : vector<28x128xf32>
    %21 = tpu.matmul %18, %20, %cst_10 {dimension_numbers = #tpu.dot_dimension_numbers<[1], [0], [0], [1], [0, 0, 1, 1], [], []>} : vector<28x32xbf16>, vector<32x128xbf16>, vector<28x128xf32> -> vector<28x128xf32>
    %22 = vector.extract_strided_slice %21 {offsets = [0, 0], sizes = [28, 32], strides = [1, 1]} : vector<28x128xf32> to vector<28x32xf32>
    %cst_11 = arith.constant 0.353553385 : f32
    %23 = vector.broadcast %cst_11 : f32 to vector<28x32xf32>
    %24 = arith.mulf %22, %23 : vector<28x32xf32>
    %25 = arith.truncf %24 : vector<28x32xf32> to vector<28x32xbf16>
    %26 = vector.extract_strided_slice %21 {offsets = [0, 32], sizes = [28, 32], strides = [1, 1]} : vector<28x128xf32> to vector<28x32xf32>
    %27 = arith.truncf %26 : vector<28x32xf32> to vector<28x32xbf16>
    %28 = vector.extract_strided_slice %21 {offsets = [0, 64], sizes = [28, 32], strides = [1, 1]} : vector<28x128xf32> to vector<28x32xf32>
    %29 = arith.truncf %28 : vector<28x32xf32> to vector<28x32xbf16>
    %30 = tpu.iota {dimensions = array<i32: 0>} : vector<28x28xi32>
    %31 = tpu.iota {dimensions = array<i32: 1>} : vector<28x28xi32>
    %32 = arith.cmpi sle, %31, %30 : vector<28x28xi32>
    %c14_i32 = arith.constant 14 : i32
    %33 = vector.broadcast %c14_i32 : i32 to vector<28x28xi32>
    %34 = arith.cmpi slt, %30, %33 : vector<28x28xi32>
    %c14_i32_12 = arith.constant 14 : i32
    %35 = vector.broadcast %c14_i32_12 : i32 to vector<28x28xi32>
    %36 = arith.cmpi slt, %31, %35 : vector<28x28xi32>
    %37 = arith.andi %34, %36 : vector<28x28xi1>
    %c14_i32_13 = arith.constant 14 : i32
    %38 = vector.broadcast %c14_i32_13 : i32 to vector<28x28xi32>
    %39 = arith.cmpi sge, %30, %38 : vector<28x28xi32>
    %c14_i32_14 = arith.constant 14 : i32
    %40 = vector.broadcast %c14_i32_14 : i32 to vector<28x28xi32>
    %41 = arith.cmpi sge, %31, %40 : vector<28x28xi32>
    %42 = arith.andi %39, %41 : vector<28x28xi1>
    %43 = arith.ori %37, %42 : vector<28x28xi1>
    %44 = arith.andi %32, %43 : vector<28x28xi1>
    %cst_15 = arith.constant 0.000000e+00 : f32
    %cst_16 = arith.constant -1.000000e+30 : f32
    %45 = vector.broadcast %cst_15 : f32 to vector<28x28xf32>
    %46 = vector.broadcast %cst_16 : f32 to vector<28x28xf32>
    %47 = arith.select %44, %45, %46 : vector<28x28xi1>, vector<28x28xf32>
    %48 = vector.extract_strided_slice %25 {offsets = [0, 0], sizes = [28, 8], strides = [1, 1]} : vector<28x32xbf16> to vector<28x8xbf16>
    %49 = vector.extract_strided_slice %27 {offsets = [0, 0], sizes = [28, 8], strides = [1, 1]} : vector<28x32xbf16> to vector<28x8xbf16>
    %50 = vector.extract_strided_slice %29 {offsets = [0, 0], sizes = [28, 8], strides = [1, 1]} : vector<28x32xbf16> to vector<28x8xbf16>
    %cst_17 = arith.constant dense<0.000000e+00> : vector<28x28xf32>
    %51 = tpu.matmul %48, %49, %cst_17 {dimension_numbers = #tpu.dot_dimension_numbers<[1], [1], [0], [0], [0, 0, 1, 0], [], []>} : vector<28x8xbf16>, vector<28x8xbf16>, vector<28x28xf32> -> vector<28x28xf32>
    %52 = arith.addf %51, %47 : vector<28x28xf32>
    %cst_18 = arith.constant dense<0xFF800000> : vector<28xf32>
    %53 = vector.multi_reduction <maximumf>, %52, %cst_18 [1] : vector<28x28xf32> to vector<28xf32>
    %54 = vector.shape_cast %53 : vector<28xf32> to vector<28x1xf32>
    %55 = vector.broadcast %54 : vector<28x1xf32> to vector<28x28xf32>
    %56 = arith.subf %52, %55 : vector<28x28xf32>
    %57 = math.exp %56 : vector<28x28xf32>
    %cst_19 = arith.constant dense<0.000000e+00> : vector<28xf32>
    %58 = vector.multi_reduction <add>, %57, %cst_19 [1] : vector<28x28xf32> to vector<28xf32>
    %59 = vector.shape_cast %58 : vector<28xf32> to vector<28x1xf32>
    %60 = tpu.reciprocal %59 {approx = true} : vector<28x1xf32> -> vector<28x1xf32>
    %61 = vector.broadcast %60 : vector<28x1xf32> to vector<28x28xf32>
    %62 = arith.mulf %57, %61 : vector<28x28xf32>
    %63 = arith.truncf %62 : vector<28x28xf32> to vector<28x28xbf16>
    %cst_20 = arith.constant dense<0.000000e+00> : vector<28x8xf32>
    %64 = tpu.matmul %63, %50, %cst_20 {dimension_numbers = #tpu.dot_dimension_numbers<[1], [0], [0], [1], [0, 0, 1, 1], [], []>} : vector<28x28xbf16>, vector<28x8xbf16>, vector<28x8xf32> -> vector<28x8xf32>
    %c0_21 = arith.constant 0 : index
    %c0_22 = arith.constant 0 : index
    %65 = vector.load %arg12[%c0_21, %c0_22] : memref<28x32xf32, #tpu.memory_space<vmem>>, vector<28x8xf32>
    tpu.vector_store %arg12[%c0_21, %c0_22], %64 {strides = array<i32>} : memref<28x32xf32, #tpu.memory_space<vmem>>, vector<28x8xf32>,
    %66 = vector.extract_strided_slice %25 {offsets = [0, 8], sizes = [28, 8], strides = [1, 1]} : vector<28x32xbf16> to vector<28x8xbf16>
    %67 = vector.extract_strided_slice %27 {offsets = [0, 8], sizes = [28, 8], strides = [1, 1]} : vector<28x32xbf16> to vector<28x8xbf16>
    %68 = vector.extract_strided_slice %29 {offsets = [0, 8], sizes = [28, 8], strides = [1, 1]} : vector<28x32xbf16> to vector<28x8xbf16>
    %cst_23 = arith.constant dense<0.000000e+00> : vector<28x28xf32>
    %69 = tpu.matmul %66, %67, %cst_23 {dimension_numbers = #tpu.dot_dimension_numbers<[1], [1], [0], [0], [0, 0, 1, 0], [], []>} : vector<28x8xbf16>, vector<28x8xbf16>, vector<28x28xf32> -> vector<28x28xf32>
    %70 = arith.addf %69, %47 : vector<28x28xf32>
    %cst_24 = arith.constant dense<0xFF800000> : vector<28xf32>
    %71 = vector.multi_reduction <maximumf>, %70, %cst_24 [1] : vector<28x28xf32> to vector<28xf32>
    %72 = vector.shape_cast %71 : vector<28xf32> to vector<28x1xf32>
    %73 = vector.broadcast %72 : vector<28x1xf32> to vector<28x28xf32>
    %74 = arith.subf %70, %73 : vector<28x28xf32>
    %75 = math.exp %74 : vector<28x28xf32>
    %cst_25 = arith.constant dense<0.000000e+00> : vector<28xf32>
    %76 = vector.multi_reduction <add>, %75, %cst_25 [1] : vector<28x28xf32> to vector<28xf32>
    %77 = vector.shape_cast %76 : vector<28xf32> to vector<28x1xf32>
    %78 = tpu.reciprocal %77 {approx = true} : vector<28x1xf32> -> vector<28x1xf32>
    %79 = vector.broadcast %78 : vector<28x1xf32> to vector<28x28xf32>
    %80 = arith.mulf %75, %79 : vector<28x28xf32>
    %81 = arith.truncf %80 : vector<28x28xf32> to vector<28x28xbf16>
    %cst_26 = arith.constant dense<0.000000e+00> : vector<28x8xf32>
    %82 = tpu.matmul %81, %68, %cst_26 {dimension_numbers = #tpu.dot_dimension_numbers<[1], [0], [0], [1], [0, 0, 1, 1], [], []>} : vector<28x28xbf16>, vector<28x8xbf16>, vector<28x8xf32> -> vector<28x8xf32>
    %c0_27 = arith.constant 0 : index
    %c8 = arith.constant 8 : index
    %83 = vector.load %arg12[%c0_27, %c8] : memref<28x32xf32, #tpu.memory_space<vmem>>, vector<28x8xf32>
    tpu.vector_store %arg12[%c0_27, %c8], %82 {strides = array<i32>} : memref<28x32xf32, #tpu.memory_space<vmem>>, vector<28x8xf32>,
    %84 = vector.extract_strided_slice %25 {offsets = [0, 16], sizes = [28, 8], strides = [1, 1]} : vector<28x32xbf16> to vector<28x8xbf16>
    %85 = vector.extract_strided_slice %27 {offsets = [0, 16], sizes = [28, 8], strides = [1, 1]} : vector<28x32xbf16> to vector<28x8xbf16>
    %86 = vector.extract_strided_slice %29 {offsets = [0, 16], sizes = [28, 8], strides = [1, 1]} : vector<28x32xbf16> to vector<28x8xbf16>
    %cst_28 = arith.constant dense<0.000000e+00> : vector<28x28xf32>
    %87 = tpu.matmul %84, %85, %cst_28 {dimension_numbers = #tpu.dot_dimension_numbers<[1], [1], [0], [0], [0, 0, 1, 0], [], []>} : vector<28x8xbf16>, vector<28x8xbf16>, vector<28x28xf32> -> vector<28x28xf32>
    %88 = arith.addf %87, %47 : vector<28x28xf32>
    %cst_29 = arith.constant dense<0xFF800000> : vector<28xf32>
    %89 = vector.multi_reduction <maximumf>, %88, %cst_29 [1] : vector<28x28xf32> to vector<28xf32>
    %90 = vector.shape_cast %89 : vector<28xf32> to vector<28x1xf32>
    %91 = vector.broadcast %90 : vector<28x1xf32> to vector<28x28xf32>
    %92 = arith.subf %88, %91 : vector<28x28xf32>
    %93 = math.exp %92 : vector<28x28xf32>
    %cst_30 = arith.constant dense<0.000000e+00> : vector<28xf32>
    %94 = vector.multi_reduction <add>, %93, %cst_30 [1] : vector<28x28xf32> to vector<28xf32>
    %95 = vector.shape_cast %94 : vector<28xf32> to vector<28x1xf32>
    %96 = tpu.reciprocal %95 {approx = true} : vector<28x1xf32> -> vector<28x1xf32>
    %97 = vector.broadcast %96 : vector<28x1xf32> to vector<28x28xf32>
    %98 = arith.mulf %93, %97 : vector<28x28xf32>
    %99 = arith.truncf %98 : vector<28x28xf32> to vector<28x28xbf16>
    %cst_31 = arith.constant dense<0.000000e+00> : vector<28x8xf32>
    %100 = tpu.matmul %99, %86, %cst_31 {dimension_numbers = #tpu.dot_dimension_numbers<[1], [0], [0], [1], [0, 0, 1, 1], [], []>} : vector<28x28xbf16>, vector<28x8xbf16>, vector<28x8xf32> -> vector<28x8xf32>
    %c0_32 = arith.constant 0 : index
    %c16 = arith.constant 16 : index
    %101 = vector.load %arg12[%c0_32, %c16] : memref<28x32xf32, #tpu.memory_space<vmem>>, vector<28x8xf32>
    tpu.vector_store %arg12[%c0_32, %c16], %100 {strides = array<i32>} : memref<28x32xf32, #tpu.memory_space<vmem>>, vector<28x8xf32>,
    %102 = vector.extract_strided_slice %25 {offsets = [0, 24], sizes = [28, 8], strides = [1, 1]} : vector<28x32xbf16> to vector<28x8xbf16>
    %103 = vector.extract_strided_slice %27 {offsets = [0, 24], sizes = [28, 8], strides = [1, 1]} : vector<28x32xbf16> to vector<28x8xbf16>
    %104 = vector.extract_strided_slice %29 {offsets = [0, 24], sizes = [28, 8], strides = [1, 1]} : vector<28x32xbf16> to vector<28x8xbf16>
    %cst_33 = arith.constant dense<0.000000e+00> : vector<28x28xf32>
    %105 = tpu.matmul %102, %103, %cst_33 {dimension_numbers = #tpu.dot_dimension_numbers<[1], [1], [0], [0], [0, 0, 1, 0], [], []>} : vector<28x8xbf16>, vector<28x8xbf16>, vector<28x28xf32> -> vector<28x28xf32>
    %106 = arith.addf %105, %47 : vector<28x28xf32>
    %cst_34 = arith.constant dense<0xFF800000> : vector<28xf32>
    %107 = vector.multi_reduction <maximumf>, %106, %cst_34 [1] : vector<28x28xf32> to vector<28xf32>
    %108 = vector.shape_cast %107 : vector<28xf32> to vector<28x1xf32>
    %109 = vector.broadcast %108 : vector<28x1xf32> to vector<28x28xf32>
    %110 = arith.subf %106, %109 : vector<28x28xf32>
    %111 = math.exp %110 : vector<28x28xf32>
    %cst_35 = arith.constant dense<0.000000e+00> : vector<28xf32>
    %112 = vector.multi_reduction <add>, %111, %cst_35 [1] : vector<28x28xf32> to vector<28xf32>
    %113 = vector.shape_cast %112 : vector<28xf32> to vector<28x1xf32>
    %114 = tpu.reciprocal %113 {approx = true} : vector<28x1xf32> -> vector<28x1xf32>
    %115 = vector.broadcast %114 : vector<28x1xf32> to vector<28x28xf32>
    %116 = arith.mulf %111, %115 : vector<28x28xf32>
    %117 = arith.truncf %116 : vector<28x28xf32> to vector<28x28xbf16>
    %cst_36 = arith.constant dense<0.000000e+00> : vector<28x8xf32>
    %118 = tpu.matmul %117, %104, %cst_36 {dimension_numbers = #tpu.dot_dimension_numbers<[1], [0], [0], [1], [0, 0, 1, 1], [], []>} : vector<28x28xbf16>, vector<28x8xbf16>, vector<28x8xf32> -> vector<28x8xf32>
    %c0_37 = arith.constant 0 : index
    %c24 = arith.constant 24 : index
    %119 = vector.load %arg12[%c0_37, %c24] : memref<28x32xf32, #tpu.memory_space<vmem>>, vector<28x8xf32>
    tpu.vector_store %arg12[%c0_37, %c24], %118 {strides = array<i32>} : memref<28x32xf32, #tpu.memory_space<vmem>>, vector<28x8xf32>,
    %c0_38 = arith.constant 0 : index
    %c0_39 = arith.constant 0 : index
    %120 = vector.load %arg12[%c0_38, %c0_39] : memref<28x32xf32, #tpu.memory_space<vmem>>, vector<28x32xf32>
    %121 = arith.truncf %120 : vector<28x32xf32> to vector<28x32xbf16>
    %c0_40 = arith.constant 0 : index
    %c0_41 = arith.constant 0 : index
    %c0_42 = arith.constant 0 : index
    %122 = vector.load %arg4[%c0_40, %c0_41, %c0_42] : memref<1x32x32xbf16, #tpu.memory_space<vmem>>, vector<1x32x32xbf16>
    %123 = vector.shape_cast %122 : vector<1x32x32xbf16> to vector<32x32xbf16>
    %cst_43 = arith.constant dense<0.000000e+00> : vector<28x32xf32>
    %124 = tpu.matmul %121, %123, %cst_43 {dimension_numbers = #tpu.dot_dimension_numbers<[1], [0], [0], [1], [0, 0, 1, 1], [], []>} : vector<28x32xbf16>, vector<32x32xbf16>, vector<28x32xf32> -> vector<28x32xf32>
    %125 = arith.addf %3, %124 : vector<28x32xf32>
    %126 = arith.mulf %125, %125 : vector<28x32xf32>
    %cst_44 = arith.constant dense<0.000000e+00> : vector<28xf32>
    %127 = vector.multi_reduction <add>, %126, %cst_44 [1] : vector<28x32xf32> to vector<28xf32>
    %128 = vector.shape_cast %127 : vector<28xf32> to vector<28x1xf32>
    %cst_45 = arith.constant 3.200000e+01 : f32
    %129 = vector.broadcast %cst_45 : f32 to vector<28x1xf32>
    %130 = arith.divf %128, %129 : vector<28x1xf32>
    %cst_46 = arith.constant 9.99999997E-7 : f32
    %131 = vector.broadcast %cst_46 : f32 to vector<28x1xf32>
    %132 = arith.addf %130, %131 : vector<28x1xf32>
    %133 = math.rsqrt %132 : vector<28x1xf32>
    %134 = vector.broadcast %133 : vector<28x1xf32> to vector<28x32xf32>
    %135 = arith.mulf %125, %134 : vector<28x32xf32>
    %c0_47 = arith.constant 0 : index
    %c0_48 = arith.constant 0 : index
    %c0_49 = arith.constant 0 : index
    %136 = vector.load %arg5[%c0_47, %c0_48, %c0_49] : memref<1x1x32xf32, #tpu.memory_space<vmem>>, vector<1x1x32xf32>
    %137 = vector.shape_cast %136 : vector<1x1x32xf32> to vector<1x32xf32>
    %138 = vector.broadcast %137 : vector<1x32xf32> to vector<28x32xf32>
    %139 = arith.mulf %135, %138 : vector<28x32xf32>
    %140 = arith.truncf %139 : vector<28x32xf32> to vector<28x32xbf16>
    %c0_50 = arith.constant 0 : index
    %c0_51 = arith.constant 0 : index
    %c0_52 = arith.constant 0 : index
    %141 = vector.load %arg6[%c0_50, %c0_51, %c0_52] : memref<1x32x128xbf16, #tpu.memory_space<vmem>>, vector<1x32x128xbf16>
    %142 = vector.shape_cast %141 : vector<1x32x128xbf16> to vector<32x128xbf16>
    %cst_53 = arith.constant dense<0.000000e+00> : vector<28x128xf32>
    %143 = tpu.matmul %140, %142, %cst_53 {dimension_numbers = #tpu.dot_dimension_numbers<[1], [0], [0], [1], [0, 0, 1, 1], [], []>} : vector<28x32xbf16>, vector<32x128xbf16>, vector<28x128xf32> -> vector<28x128xf32>
    %144 = vector.extract_strided_slice %143 {offsets = [0, 0], sizes = [28, 64], strides = [1, 1]} : vector<28x128xf32> to vector<28x64xf32>
    %145 = vector.extract_strided_slice %143 {offsets = [0, 64], sizes = [28, 64], strides = [1, 1]} : vector<28x128xf32> to vector<28x64xf32>
    %146 = arith.negf %144 : vector<28x64xf32>
    %147 = math.exp %146 : vector<28x64xf32>
    %cst_54 = arith.constant 1.000000e+00 : f32
    %148 = vector.broadcast %cst_54 : f32 to vector<28x64xf32>
    %149 = arith.addf %148, %147 : vector<28x64xf32>
    %150 = arith.divf %148, %149 : vector<28x64xf32>
    %151 = arith.mulf %144, %150 : vector<28x64xf32>
    %152 = arith.mulf %151, %145 : vector<28x64xf32>
    %153 = arith.truncf %152 : vector<28x64xf32> to vector<28x64xbf16>
    %c0_55 = arith.constant 0 : index
    %c0_56 = arith.constant 0 : index
    %c0_57 = arith.constant 0 : index
    %154 = vector.load %arg7[%c0_55, %c0_56, %c0_57] : memref<1x64x32xbf16, #tpu.memory_space<vmem>>, vector<1x64x32xbf16>
    %155 = vector.shape_cast %154 : vector<1x64x32xbf16> to vector<64x32xbf16>
    %cst_58 = arith.constant dense<0.000000e+00> : vector<28x32xf32>
    %156 = tpu.matmul %153, %155, %cst_58 {dimension_numbers = #tpu.dot_dimension_numbers<[1], [0], [0], [1], [0, 0, 1, 1], [], []>} : vector<28x64xbf16>, vector<64x32xbf16>, vector<28x32xf32> -> vector<28x32xf32>
    %157 = arith.addf %125, %156 : vector<28x32xf32>
    %c0_59 = arith.constant 0 : index
    %c0_60 = arith.constant 0 : index
    %158 = vector.load %arg10[%c0_59, %c0_60] : memref<28x32xf32, #tpu.memory_space<vmem>>, vector<28x32xf32>
    tpu.vector_store %arg10[%c0_59, %c0_60], %157 {strides = array<i32>} : memref<28x32xf32, #tpu.memory_space<vmem>>, vector<28x32xf32>,
    %c1_i32 = arith.constant 1 : i32
    %159 = arith.cmpi eq, %arg0, %c1_i32 : i32
    %160 = arith.extui %159 : i1 to i32
    %c0_i32_61 = arith.constant 0 : i32
    %161 = arith.cmpi ne, %160, %c0_i32_61 : i32
    scf.if %161 {
      %162 = arith.truncf %157 : vector<28x32xf32> to vector<28x32xbf16>
      %c0_62 = arith.constant 0 : index
      %c0_63 = arith.constant 0 : index
      %163 = vector.load %arg9[%c0_62, %c0_63] : memref<1x128xf32, #tpu.memory_space<vmem>>, vector<1x128xf32>
      %c0_64 = arith.constant 0 : index
      %c0_65 = arith.constant 0 : index
      %164 = vector.load %arg9[%c0_64, %c0_65] : memref<1x128xf32, #tpu.memory_space<vmem>>, vector<1x128xf32>
      %c0_66 = arith.constant 0 : index
      %c0_67 = arith.constant 0 : index
      %c0_68 = arith.constant 0 : index
      %165 = vector.load %arg8[%c0_66, %c0_67, %c0_68] : memref<14x32x128xbf16, #tpu.memory_space<vmem>>, vector<1x32x128xbf16>
      %166 = vector.shape_cast %165 : vector<1x32x128xbf16> to vector<32x128xbf16>
      %cst_69 = arith.constant dense<0.000000e+00> : vector<28x128xf32>
      %167 = tpu.matmul %162, %166, %cst_69 {dimension_numbers = #tpu.dot_dimension_numbers<[1], [0], [0], [1], [0, 0, 1, 1], [], []>} : vector<28x32xbf16>, vector<32x128xbf16>, vector<28x128xf32> -> vector<28x128xf32>
      %168 = vector.extract_strided_slice %167 {offsets = [0, 0], sizes = [1, 128], strides = [1, 1]} : vector<28x128xf32> to vector<1x128xf32>
      %169 = arith.addf %163, %168 : vector<1x128xf32>
      %170 = vector.extract_strided_slice %167 {offsets = [14, 0], sizes = [1, 128], strides = [1, 1]} : vector<28x128xf32> to vector<1x128xf32>
      %171 = arith.addf %164, %170 : vector<1x128xf32>
      %c1 = arith.constant 1 : index
      %c0_70 = arith.constant 0 : index
      %c0_71 = arith.constant 0 : index
      %172 = vector.load %arg8[%c1, %c0_70, %c0_71] : memref<14x32x128xbf16, #tpu.memory_space<vmem>>, vector<1x32x128xbf16>
      %173 = vector.shape_cast %172 : vector<1x32x128xbf16> to vector<32x128xbf16>
      %cst_72 = arith.constant dense<0.000000e+00> : vector<28x128xf32>
      %174 = tpu.matmul %162, %173, %cst_72 {dimension_numbers = #tpu.dot_dimension_numbers<[1], [0], [0], [1], [0, 0, 1, 1], [], []>} : vector<28x32xbf16>, vector<32x128xbf16>, vector<28x128xf32> -> vector<28x128xf32>
      %175 = vector.extract_strided_slice %174 {offsets = [1, 0], sizes = [1, 128], strides = [1, 1]} : vector<28x128xf32> to vector<1x128xf32>
      %176 = arith.addf %169, %175 : vector<1x128xf32>
      %177 = vector.extract_strided_slice %174 {offsets = [15, 0], sizes = [1, 128], strides = [1, 1]} : vector<28x128xf32> to vector<1x128xf32>
      %178 = arith.addf %171, %177 : vector<1x128xf32>
      %c2 = arith.constant 2 : index
      %c0_73 = arith.constant 0 : index
      %c0_74 = arith.constant 0 : index
      %179 = vector.load %arg8[%c2, %c0_73, %c0_74] : memref<14x32x128xbf16, #tpu.memory_space<vmem>>, vector<1x32x128xbf16>
      %180 = vector.shape_cast %179 : vector<1x32x128xbf16> to vector<32x128xbf16>
      %cst_75 = arith.constant dense<0.000000e+00> : vector<28x128xf32>
      %181 = tpu.matmul %162, %180, %cst_75 {dimension_numbers = #tpu.dot_dimension_numbers<[1], [0], [0], [1], [0, 0, 1, 1], [], []>} : vector<28x32xbf16>, vector<32x128xbf16>, vector<28x128xf32> -> vector<28x128xf32>
      %182 = vector.extract_strided_slice %181 {offsets = [2, 0], sizes = [1, 128], strides = [1, 1]} : vector<28x128xf32> to vector<1x128xf32>
      %183 = arith.addf %176, %182 : vector<1x128xf32>
      %184 = vector.extract_strided_slice %181 {offsets = [16, 0], sizes = [1, 128], strides = [1, 1]} : vector<28x128xf32> to vector<1x128xf32>
      %185 = arith.addf %178, %184 : vector<1x128xf32>
      %c3 = arith.constant 3 : index
      %c0_76 = arith.constant 0 : index
      %c0_77 = arith.constant 0 : index
      %186 = vector.load %arg8[%c3, %c0_76, %c0_77] : memref<14x32x128xbf16, #tpu.memory_space<vmem>>, vector<1x32x128xbf16>
      %187 = vector.shape_cast %186 : vector<1x32x128xbf16> to vector<32x128xbf16>
      %cst_78 = arith.constant dense<0.000000e+00> : vector<28x128xf32>
      %188 = tpu.matmul %162, %187, %cst_78 {dimension_numbers = #tpu.dot_dimension_numbers<[1], [0], [0], [1], [0, 0, 1, 1], [], []>} : vector<28x32xbf16>, vector<32x128xbf16>, vector<28x128xf32> -> vector<28x128xf32>
      %189 = vector.extract_strided_slice %188 {offsets = [3, 0], sizes = [1, 128], strides = [1, 1]} : vector<28x128xf32> to vector<1x128xf32>
      %190 = arith.addf %183, %189 : vector<1x128xf32>
      %191 = vector.extract_strided_slice %188 {offsets = [17, 0], sizes = [1, 128], strides = [1, 1]} : vector<28x128xf32> to vector<1x128xf32>
      %192 = arith.addf %185, %191 : vector<1x128xf32>
      %c4 = arith.constant 4 : index
      %c0_79 = arith.constant 0 : index
      %c0_80 = arith.constant 0 : index
      %193 = vector.load %arg8[%c4, %c0_79, %c0_80] : memref<14x32x128xbf16, #tpu.memory_space<vmem>>, vector<1x32x128xbf16>
      %194 = vector.shape_cast %193 : vector<1x32x128xbf16> to vector<32x128xbf16>
      %cst_81 = arith.constant dense<0.000000e+00> : vector<28x128xf32>
      %195 = tpu.matmul %162, %194, %cst_81 {dimension_numbers = #tpu.dot_dimension_numbers<[1], [0], [0], [1], [0, 0, 1, 1], [], []>} : vector<28x32xbf16>, vector<32x128xbf16>, vector<28x128xf32> -> vector<28x128xf32>
      %196 = vector.extract_strided_slice %195 {offsets = [4, 0], sizes = [1, 128], strides = [1, 1]} : vector<28x128xf32> to vector<1x128xf32>
      %197 = arith.addf %190, %196 : vector<1x128xf32>
      %198 = vector.extract_strided_slice %195 {offsets = [18, 0], sizes = [1, 128], strides = [1, 1]} : vector<28x128xf32> to vector<1x128xf32>
      %199 = arith.addf %192, %198 : vector<1x128xf32>
      %c5 = arith.constant 5 : index
      %c0_82 = arith.constant 0 : index
      %c0_83 = arith.constant 0 : index
      %200 = vector.load %arg8[%c5, %c0_82, %c0_83] : memref<14x32x128xbf16, #tpu.memory_space<vmem>>, vector<1x32x128xbf16>
      %201 = vector.shape_cast %200 : vector<1x32x128xbf16> to vector<32x128xbf16>
      %cst_84 = arith.constant dense<0.000000e+00> : vector<28x128xf32>
      %202 = tpu.matmul %162, %201, %cst_84 {dimension_numbers = #tpu.dot_dimension_numbers<[1], [0], [0], [1], [0, 0, 1, 1], [], []>} : vector<28x32xbf16>, vector<32x128xbf16>, vector<28x128xf32> -> vector<28x128xf32>
      %203 = vector.extract_strided_slice %202 {offsets = [5, 0], sizes = [1, 128], strides = [1, 1]} : vector<28x128xf32> to vector<1x128xf32>
      %204 = arith.addf %197, %203 : vector<1x128xf32>
      %205 = vector.extract_strided_slice %202 {offsets = [19, 0], sizes = [1, 128], strides = [1, 1]} : vector<28x128xf32> to vector<1x128xf32>
      %206 = arith.addf %199, %205 : vector<1x128xf32>
      %c6 = arith.constant 6 : index
      %c0_85 = arith.constant 0 : index
      %c0_86 = arith.constant 0 : index
      %207 = vector.load %arg8[%c6, %c0_85, %c0_86] : memref<14x32x128xbf16, #tpu.memory_space<vmem>>, vector<1x32x128xbf16>
      %208 = vector.shape_cast %207 : vector<1x32x128xbf16> to vector<32x128xbf16>
      %cst_87 = arith.constant dense<0.000000e+00> : vector<28x128xf32>
      %209 = tpu.matmul %162, %208, %cst_87 {dimension_numbers = #tpu.dot_dimension_numbers<[1], [0], [0], [1], [0, 0, 1, 1], [], []>} : vector<28x32xbf16>, vector<32x128xbf16>, vector<28x128xf32> -> vector<28x128xf32>
      %210 = vector.extract_strided_slice %209 {offsets = [6, 0], sizes = [1, 128], strides = [1, 1]} : vector<28x128xf32> to vector<1x128xf32>
      %211 = arith.addf %204, %210 : vector<1x128xf32>
      %212 = vector.extract_strided_slice %209 {offsets = [20, 0], sizes = [1, 128], strides = [1, 1]} : vector<28x128xf32> to vector<1x128xf32>
      %213 = arith.addf %206, %212 : vector<1x128xf32>
      %c7 = arith.constant 7 : index
      %c0_88 = arith.constant 0 : index
      %c0_89 = arith.constant 0 : index
      %214 = vector.load %arg8[%c7, %c0_88, %c0_89] : memref<14x32x128xbf16, #tpu.memory_space<vmem>>, vector<1x32x128xbf16>
      %215 = vector.shape_cast %214 : vector<1x32x128xbf16> to vector<32x128xbf16>
      %cst_90 = arith.constant dense<0.000000e+00> : vector<28x128xf32>
      %216 = tpu.matmul %162, %215, %cst_90 {dimension_numbers = #tpu.dot_dimension_numbers<[1], [0], [0], [1], [0, 0, 1, 1], [], []>} : vector<28x32xbf16>, vector<32x128xbf16>, vector<28x128xf32> -> vector<28x128xf32>
      %217 = vector.extract_strided_slice %216 {offsets = [7, 0], sizes = [1, 128], strides = [1, 1]} : vector<28x128xf32> to vector<1x128xf32>
      %218 = arith.addf %211, %217 : vector<1x128xf32>
      %219 = vector.extract_strided_slice %216 {offsets = [21, 0], sizes = [1, 128], strides = [1, 1]} : vector<28x128xf32> to vector<1x128xf32>
      %220 = arith.addf %213, %219 : vector<1x128xf32>
      %c8_91 = arith.constant 8 : index
      %c0_92 = arith.constant 0 : index
      %c0_93 = arith.constant 0 : index
      %221 = vector.load %arg8[%c8_91, %c0_92, %c0_93] : memref<14x32x128xbf16, #tpu.memory_space<vmem>>, vector<1x32x128xbf16>
      %222 = vector.shape_cast %221 : vector<1x32x128xbf16> to vector<32x128xbf16>
      %cst_94 = arith.constant dense<0.000000e+00> : vector<28x128xf32>
      %223 = tpu.matmul %162, %222, %cst_94 {dimension_numbers = #tpu.dot_dimension_numbers<[1], [0], [0], [1], [0, 0, 1, 1], [], []>} : vector<28x32xbf16>, vector<32x128xbf16>, vector<28x128xf32> -> vector<28x128xf32>
      %224 = vector.extract_strided_slice %223 {offsets = [8, 0], sizes = [1, 128], strides = [1, 1]} : vector<28x128xf32> to vector<1x128xf32>
      %225 = arith.addf %218, %224 : vector<1x128xf32>
      %226 = vector.extract_strided_slice %223 {offsets = [22, 0], sizes = [1, 128], strides = [1, 1]} : vector<28x128xf32> to vector<1x128xf32>
      %227 = arith.addf %220, %226 : vector<1x128xf32>
      %c9 = arith.constant 9 : index
      %c0_95 = arith.constant 0 : index
      %c0_96 = arith.constant 0 : index
      %228 = vector.load %arg8[%c9, %c0_95, %c0_96] : memref<14x32x128xbf16, #tpu.memory_space<vmem>>, vector<1x32x128xbf16>
      %229 = vector.shape_cast %228 : vector<1x32x128xbf16> to vector<32x128xbf16>
      %cst_97 = arith.constant dense<0.000000e+00> : vector<28x128xf32>
      %230 = tpu.matmul %162, %229, %cst_97 {dimension_numbers = #tpu.dot_dimension_numbers<[1], [0], [0], [1], [0, 0, 1, 1], [], []>} : vector<28x32xbf16>, vector<32x128xbf16>, vector<28x128xf32> -> vector<28x128xf32>
      %231 = vector.extract_strided_slice %230 {offsets = [9, 0], sizes = [1, 128], strides = [1, 1]} : vector<28x128xf32> to vector<1x128xf32>
      %232 = arith.addf %225, %231 : vector<1x128xf32>
      %233 = vector.extract_strided_slice %230 {offsets = [23, 0], sizes = [1, 128], strides = [1, 1]} : vector<28x128xf32> to vector<1x128xf32>
      %234 = arith.addf %227, %233 : vector<1x128xf32>
      %c10 = arith.constant 10 : index
      %c0_98 = arith.constant 0 : index
      %c0_99 = arith.constant 0 : index
      %235 = vector.load %arg8[%c10, %c0_98, %c0_99] : memref<14x32x128xbf16, #tpu.memory_space<vmem>>, vector<1x32x128xbf16>
      %236 = vector.shape_cast %235 : vector<1x32x128xbf16> to vector<32x128xbf16>
      %cst_100 = arith.constant dense<0.000000e+00> : vector<28x128xf32>
      %237 = tpu.matmul %162, %236, %cst_100 {dimension_numbers = #tpu.dot_dimension_numbers<[1], [0], [0], [1], [0, 0, 1, 1], [], []>} : vector<28x32xbf16>, vector<32x128xbf16>, vector<28x128xf32> -> vector<28x128xf32>
      %238 = vector.extract_strided_slice %237 {offsets = [10, 0], sizes = [1, 128], strides = [1, 1]} : vector<28x128xf32> to vector<1x128xf32>
      %239 = arith.addf %232, %238 : vector<1x128xf32>
      %240 = vector.extract_strided_slice %237 {offsets = [24, 0], sizes = [1, 128], strides = [1, 1]} : vector<28x128xf32> to vector<1x128xf32>
      %241 = arith.addf %234, %240 : vector<1x128xf32>
      %c11 = arith.constant 11 : index
      %c0_101 = arith.constant 0 : index
      %c0_102 = arith.constant 0 : index
      %242 = vector.load %arg8[%c11, %c0_101, %c0_102] : memref<14x32x128xbf16, #tpu.memory_space<vmem>>, vector<1x32x128xbf16>
      %243 = vector.shape_cast %242 : vector<1x32x128xbf16> to vector<32x128xbf16>
      %cst_103 = arith.constant dense<0.000000e+00> : vector<28x128xf32>
      %244 = tpu.matmul %162, %243, %cst_103 {dimension_numbers = #tpu.dot_dimension_numbers<[1], [0], [0], [1], [0, 0, 1, 1], [], []>} : vector<28x32xbf16>, vector<32x128xbf16>, vector<28x128xf32> -> vector<28x128xf32>
      %245 = vector.extract_strided_slice %244 {offsets = [11, 0], sizes = [1, 128], strides = [1, 1]} : vector<28x128xf32> to vector<1x128xf32>
      %246 = arith.addf %239, %245 : vector<1x128xf32>
      %247 = vector.extract_strided_slice %244 {offsets = [25, 0], sizes = [1, 128], strides = [1, 1]} : vector<28x128xf32> to vector<1x128xf32>
      %248 = arith.addf %241, %247 : vector<1x128xf32>
      %c12 = arith.constant 12 : index
      %c0_104 = arith.constant 0 : index
      %c0_105 = arith.constant 0 : index
      %249 = vector.load %arg8[%c12, %c0_104, %c0_105] : memref<14x32x128xbf16, #tpu.memory_space<vmem>>, vector<1x32x128xbf16>
      %250 = vector.shape_cast %249 : vector<1x32x128xbf16> to vector<32x128xbf16>
      %cst_106 = arith.constant dense<0.000000e+00> : vector<28x128xf32>
      %251 = tpu.matmul %162, %250, %cst_106 {dimension_numbers = #tpu.dot_dimension_numbers<[1], [0], [0], [1], [0, 0, 1, 1], [], []>} : vector<28x32xbf16>, vector<32x128xbf16>, vector<28x128xf32> -> vector<28x128xf32>
      %252 = vector.extract_strided_slice %251 {offsets = [12, 0], sizes = [1, 128], strides = [1, 1]} : vector<28x128xf32> to vector<1x128xf32>
      %253 = arith.addf %246, %252 : vector<1x128xf32>
      %254 = vector.extract_strided_slice %251 {offsets = [26, 0], sizes = [1, 128], strides = [1, 1]} : vector<28x128xf32> to vector<1x128xf32>
      %255 = arith.addf %248, %254 : vector<1x128xf32>
      %c13 = arith.constant 13 : index
      %c0_107 = arith.constant 0 : index
      %c0_108 = arith.constant 0 : index
      %256 = vector.load %arg8[%c13, %c0_107, %c0_108] : memref<14x32x128xbf16, #tpu.memory_space<vmem>>, vector<1x32x128xbf16>
      %257 = vector.shape_cast %256 : vector<1x32x128xbf16> to vector<32x128xbf16>
      %cst_109 = arith.constant dense<0.000000e+00> : vector<28x128xf32>
      %258 = tpu.matmul %162, %257, %cst_109 {dimension_numbers = #tpu.dot_dimension_numbers<[1], [0], [0], [1], [0, 0, 1, 1], [], []>} : vector<28x32xbf16>, vector<32x128xbf16>, vector<28x128xf32> -> vector<28x128xf32>
      %259 = vector.extract_strided_slice %258 {offsets = [13, 0], sizes = [1, 128], strides = [1, 1]} : vector<28x128xf32> to vector<1x128xf32>
      %260 = arith.addf %253, %259 : vector<1x128xf32>
      %261 = vector.extract_strided_slice %258 {offsets = [27, 0], sizes = [1, 128], strides = [1, 1]} : vector<28x128xf32> to vector<1x128xf32>
      %262 = arith.addf %255, %261 : vector<1x128xf32>
      %cst_110 = arith.constant dense<0xFF800000> : vector<1xf32>
      %263 = vector.multi_reduction <maximumf>, %260, %cst_110 [1] : vector<1x128xf32> to vector<1xf32>
      %264 = vector.shape_cast %263 : vector<1xf32> to vector<1x1xf32>
      %265 = vector.broadcast %264 : vector<1x1xf32> to vector<1x128xf32>
      %266 = arith.subf %260, %265 : vector<1x128xf32>
      %267 = math.exp %266 : vector<1x128xf32>
      %cst_111 = arith.constant dense<0.000000e+00> : vector<1xf32>
      %268 = vector.multi_reduction <add>, %267, %cst_111 [1] : vector<1x128xf32> to vector<1xf32>
      %269 = vector.shape_cast %268 : vector<1xf32> to vector<1x1xf32>
      %270 = vector.broadcast %269 : vector<1x1xf32> to vector<1x128xf32>
      %271 = arith.divf %267, %270 : vector<1x128xf32>
      %c0_112 = arith.constant 0 : index
      %c0_113 = arith.constant 0 : index
      %272 = vector.load %arg11[%c0_112, %c0_113] : memref<2x128xf32, #tpu.memory_space<vmem>>, vector<1x128xf32>
      tpu.vector_store %arg11[%c0_112, %c0_113], %271 {strides = array<i32>} : memref<2x128xf32, #tpu.memory_space<vmem>>, vector<1x128xf32>,
      %cst_114 = arith.constant dense<0xFF800000> : vector<1xf32>
      %273 = vector.multi_reduction <maximumf>, %262, %cst_114 [1] : vector<1x128xf32> to vector<1xf32>
      %274 = vector.shape_cast %273 : vector<1xf32> to vector<1x1xf32>
      %275 = vector.broadcast %274 : vector<1x1xf32> to vector<1x128xf32>
      %276 = arith.subf %262, %275 : vector<1x128xf32>
      %277 = math.exp %276 : vector<1x128xf32>
      %cst_115 = arith.constant dense<0.000000e+00> : vector<1xf32>
      %278 = vector.multi_reduction <add>, %277, %cst_115 [1] : vector<1x128xf32> to vector<1xf32>
      %279 = vector.shape_cast %278 : vector<1xf32> to vector<1x1xf32>
      %280 = vector.broadcast %279 : vector<1x1xf32> to vector<1x128xf32>
      %281 = arith.divf %277, %280 : vector<1x128xf32>
      %c1_116 = arith.constant 1 : index
      %c0_117 = arith.constant 0 : index
      %282 = vector.load %arg11[%c1_116, %c0_117] : memref<2x128xf32, #tpu.memory_space<vmem>>, vector<1x128xf32>
      tpu.vector_store %arg11[%c1_116, %c0_117], %281 {strides = array<i32>} : memref<2x128xf32, #tpu.memory_space<vmem>>, vector<1x128xf32>,
    } else {
    }
    return
  }
  func.func @transform_0(%arg0: i32) -> (i32, i32) {
    %c0_i32 = arith.constant 0 : i32
    %c0_i32_0 = arith.constant 0 : i32
    %c0_i32_1 = arith.constant 0 : i32
    return %c0_i32, %c0_i32_0 : i32, i32
  }
  func.func @transform_1(%arg0: i32) -> (i32, i32, i32) {
    %c0_i32 = arith.constant 0 : i32
    %c0_i32_0 = arith.constant 0 : i32
    %c0_i32_1 = arith.constant 0 : i32
    return %arg0, %c0_i32, %c0_i32_0 : i32, i32, i32
  }
  func.func @transform_2(%arg0: i32) -> (i32, i32, i32) {
    %c0_i32 = arith.constant 0 : i32
    %c0_i32_0 = arith.constant 0 : i32
    %c0_i32_1 = arith.constant 0 : i32
    return %arg0, %c0_i32, %c0_i32_0 : i32, i32, i32
  }
  func.func @transform_3(%arg0: i32) -> (i32, i32, i32) {
    %c0_i32 = arith.constant 0 : i32
    %c0_i32_0 = arith.constant 0 : i32
    %c0_i32_1 = arith.constant 0 : i32
    return %arg0, %c0_i32, %c0_i32_0 : i32, i32, i32
  }
  func.func @transform_4(%arg0: i32) -> (i32, i32, i32) {
    %c0_i32 = arith.constant 0 : i32
    %c0_i32_0 = arith.constant 0 : i32
    %c0_i32_1 = arith.constant 0 : i32
    return %arg0, %c0_i32, %c0_i32_0 : i32, i32, i32
  }
  func.func @transform_5(%arg0: i32) -> (i32, i32, i32) {
    %c0_i32 = arith.constant 0 : i32
    %c0_i32_0 = arith.constant 0 : i32
    %c0_i32_1 = arith.constant 0 : i32
    return %arg0, %c0_i32, %c0_i32_0 : i32, i32, i32
  }
  func.func @transform_6(%arg0: i32) -> (i32, i32, i32) {
    %c0_i32 = arith.constant 0 : i32
    %c0_i32_0 = arith.constant 0 : i32
    %c0_i32_1 = arith.constant 0 : i32
    return %arg0, %c0_i32, %c0_i32_0 : i32, i32, i32
  }
  func.func @transform_7(%arg0: i32) -> (i32, i32, i32) {
    %c0_i32 = arith.constant 0 : i32
    %c0_i32_0 = arith.constant 0 : i32
    %c0_i32_1 = arith.constant 0 : i32
    %c0_i32_2 = arith.constant 0 : i32
    return %c0_i32, %c0_i32_0, %c0_i32_1 : i32, i32, i32
  }
  func.func @transform_8(%arg0: i32) -> (i32, i32) {
    %c0_i32 = arith.constant 0 : i32
    %c0_i32_0 = arith.constant 0 : i32
    %c0_i32_1 = arith.constant 0 : i32
    return %c0_i32, %c0_i32_0 : i32, i32
  }
  func.func @transform_9(%arg0: i32) -> (i32, i32) {
    %c0_i32 = arith.constant 0 : i32
    %c0_i32_0 = arith.constant 0 : i32
    %c0_i32_1 = arith.constant 0 : i32
    return %c0_i32, %c0_i32_0 : i32, i32
  }
  func.func @transform_10(%arg0: i32) -> (i32, i32) {
    %c0_i32 = arith.constant 0 : i32
    %c0_i32_0 = arith.constant 0 : i32
    %c0_i32_1 = arith.constant 0 : i32
    return %c0_i32, %c0_i32_0 : i32, i32
  }
}

</mosaic_0001>

<bundles_post_ra>
// kernel: classifier_forward.1
= control target key start
LH: loop header
LB: loop body
LE: loop exit
PB: predicated region body
PF: predicated region fallthrough
CT: control target
= control target key end

     0   :  { %16 = vsyncpa [#allocation4], 0  ;;  %s4631_s0 = inlined_call_operand.vmem [shape: f32[28,32], index: 0, kind: input, shape index: {}]   ;;  %s4632_s1 = inlined_call_operand.vmem [shape: f32[2,1,32], index: 1, kind: input, shape index: {}]   ;;  %s4633_s2 = inlined_call_operand.vmem [shape: bf16[2,32,128], index: 2, kind: input, shape index: {}]   ;;  %s4634_s3 = inlined_call_operand.vmem [shape: bf16[2,32,32], index: 3, kind: input, shape index: {}]   ;;  %s4635_s4 = inlined_call_operand.vmem [shape: f32[2,1,32], index: 4, kind: input, shape index: {}]   ;;  %s4636_s5 = inlined_call_operand.vmem [shape: bf16[2,32,128], index: 5, kind: input, shape index: {}]   ;;  %s4637_s6 = inlined_call_operand.vmem [shape: bf16[2,64,32], index: 6, kind: input, shape index: {}]   ;;  %s4638_s7 = inlined_call_operand.vmem [shape: bf16[14,32,128], index: 7, kind: input, shape index: {}]   ;;  %s4639_s8 = inlined_call_operand.vmem [shape: f32[1,128], index: 8, kind: input, shape index: {}]   ;;  %s4640_s9 = inlined_call_operand.hbm [shape: f32[28,32], index: 9, kind: output, shape index: {0}]   ;;  %s4641_s10 = inlined_call_operand.hbm [shape: f32[2,128], index: 10, kind: output, shape index: {1}]  }
   0x1   :  { %17 = vsyncpa [#allocation6], 0  ;;  %s4088_s13 = smov 0  }
   0x2 LB: > { %s4094_s14 = sadd.s32 4294967295, %s4012_s13   ;;  %p3262_p0 = scmp.ge.s32.totalorder %s4012_s13, 1  ;;  %s4012_s13 = sphi %s4088_s13, %s23_s13  }
   0x3   : > { %p353_p1 = scmp.lt.s32.totalorder %s4012_s13, 3 }
   0x5   : > { %p354_p2 = pnand %p3262_p0, %p353_p1 }
   0x6   : > { %p407_p3 = scmp.lt.s32.totalorder (!%p354_p2), %s4094_s14, 1  ;;  %p3271_p4 = scmp.ne.s32.totalorder (!%p354_p2), %s4094_s14, 0 }
   0x7   : > { %357 = sbr.rel (%p354_p2) target bundleno = 4705 (0x1261), region = 56 }
   0xe   : > { %s4100_s15 = scalar_select %p407_p3, %s4094_s14, 1 }
   0xf   : > { %437 = sbr.rel (%p3271_p4) target bundleno = 22 (0x16), region = 60  ;;  %v438_v0 = vld [vmem:[%s4631_s0] sm:$0xff] (!%p3271_p4)  ;;  %vm442_vm0 = vcmask (!%p3271_p4), 261120   ;;  %v439_v1 = vld [vmem:[%s4631_s0 + $0x8] sm:$0xff] (!%p3271_p4)  ;;  %v440_v2 = vld [vmem:[%s4631_s0 + $0x10] sm:$0xff] (!%p3271_p4)  ;;  %vm446_vm1 = vcmask (!%p3271_p4), 257024  }
  0x10   : > { %s409_s18 = scalar_lea.vmem %s4632_s1, %s4100_s15  ;;  %s3427_s19 = sshll.u32 %s4100_s15, 4  ;;  %443 = vst.msk [vmem:[#allocation3] sm:$0xff] (!%p3271_p4), %vm442_vm0, %v438_v0  ;;  %444 = vst.msk [vmem:[#allocation3 + $0x8] sm:$0xff] (!%p3271_p4), %vm442_vm0, %v439_v1  ;;  %v441_v3 = vld [vmem:[%s4631_s0 + $0x18] sm:$0xf] (!%p3271_p4) }
  0x11   : > { %s4110_s22 = scalar_lea.vmem %s4633_s2, %s3427_s19  ;;  %s4115_s25 = scalar_lea.vmem %s4634_s3, %s3427_s19  ;;  %445 = vst.msk [vmem:[#allocation3 + $0x10] sm:$0xff] (!%p3271_p4), %vm442_vm0, %v440_v2 }
  0x12   : > { %s422_s28 = scalar_lea.vmem %s4635_s4, %s4100_s15  ;;  %s4124_s11 = scalar_lea.vmem %s4636_s5, %s3427_s19  ;;  %447 = vst.msk [vmem:[#allocation3 + $0x18] sm:$0xf] (!%p3271_p4), %vm446_vm1, %v441_v3 }
  0x13   : > { %s3430_s12 = sshll.u32 %s4100_s15, 5 }
  0x14   : > { %s4130_s20 = scalar_lea.vmem %s4637_s6, %s3430_s12 }
  0x16 PF: > { %vm4643_vm2 = vcmask 261120   ;;  %vm4642_vm3 = vcmask 257024   ;;  %v3800_v16 = vld [vmem:[%s4110_s22] sm:$0xff]   ;;  %v3801_v17 = vld [vmem:[%s4110_s22 + $0x8] sm:$0xff]   ;;  %vm626_vm4 = vcmask 64512   ;;  %v579_v61 = vlaneseq  ;;  %s4016_s16 = smov 64  }
  0x17   : > { %v448_v5 = vld [vmem:[#allocation3] sm:$0xff]  ;;  %v449_v10 = vld [vmem:[#allocation3 + $0x8] sm:$0xff]  ;;  %3537 = vmatprep.subr.bf16.mxu0 %v3800_v16  ;;  %v4015_v3 = vmov -1e+30   ;;  %s4017_s17 = smov 88   ;;  %s4018_s21 = smov 120  }
  0x18   : > { %v450_v4 = vld [vmem:[#allocation3 + $0x10] sm:$0xff]  ;;  %v452_v8 = vmul.f32 %v448_v5, %v448_v5  ;;  %v453_v11 = vmul.f32 %v449_v10, %v449_v10  ;;  %3538 = vmatpush3.bf16.msra.mxu0 %v3800_v16  ;;  %v3272_v35 = vld [vmem:[%s409_s18] ss:$0 sm:$0xff]  ;;  %s4014_s18 = smov 96   ;;  %v4176_v62 = vshrl.u32 %v579_v61, 7  ;;  %v585_v63 = vand.u32 127, %v579_v61 }
  0x19   : > { %v451_v6 = vld [vmem:[#allocation3 + $0x18] sm:$0xf]  ;;  %v454_v7 = vmul.f32 %v450_v4, %v450_v4  ;;  %3539 = vmatprep.subr.bf16.mxu0 %v3801_v17  ;;  %s4019_s23 = smov 56   ;;  %s4020_s24 = smov 80  }
  0x1a   : > { %v455_v9 = vmul.f32 %v451_v6, %v451_v6  ;;  %v457_v13 = vsel %vm4643_vm2, %v452_v8, 0.0  ;;  %v460_v15 = vsel %vm4643_vm2, %v453_v11, 0.0  ;;  %v581_v0 = vadd.s32 8, %v4176_v62  ;;  %s4021_s26 = smov 112   ;;  %s4022_s19 = smov 48  }
  0x1b   : > { %v463_v12 = vsel %vm4643_vm2, %v454_v7, 0.0  ;;  %458 = vadd.xlane.f32.xlu0 %v457_v13  ;;  %vm594_vm5 = vcmp.lt.s32.totalorder %v585_v63, 14  ;;  %vm603_vm7 = vcmp.ge.s32.totalorder %v585_v63, 14  ;;  %v583_v1 = vadd.s32 24, %v4176_v62  ;;  %s4023_s27 = smov 72   ;;  %s4024_s29 = smov 104  }
  0x1c   : > { %464 = vadd.xlane.f32.xlu1 %v463_v12  ;;  %v467_v14 = vsel %vm4642_vm3, %v455_v9, 0.0  ;;  %3540 = vmatpush3.bf16.msra.mxu0 %v3801_v17  ;;  %vm591_vm6 = vcmp.lt.s32.totalorder %v581_v0, 14  ;;  %vm600_vm8 = vcmp.ge.s32.totalorder %v581_v0, 14  ;;  %v582_v2 = vadd.s32 16, %v4176_v62  ;;  %s4025_s30 = smov 40   ;;  %s4026_s22 = smov 8  }
  0x1d   : > { %vm596_vm9 = vmand %vm591_vm6, %vm594_vm5  ;;  %vm586_vm11 = vcmp.le.s32.totalorder %v585_v63, %v4176_v62  ;;  %vm589_vm12 = vcmp.le.s32.totalorder %v585_v63, %v583_v1  ;;  %vm587_vm13 = vcmp.le.s32.totalorder %v585_v63, %v581_v0  ;;  %vm688_vm6 = vcmask 228352   ;;  %s4027_s12 = smov 16   ;;  %p3312_p5 = scmp.ne.s32.totalorder %s4094_s14, 1 }
  0x1e   : > { %vm605_vm10 = vmand %vm600_vm8, %vm603_vm7  ;;  %vm588_vm0 = vcmp.le.s32.totalorder %v585_v63, %v582_v2  ;;  %vm1005_vm8 = vcmask 126016  }
  0x1f   : > { %461 = vadd.xlane.f32.xlu0 %v460_v15  ;;  %vm609_vm14 = vmor %vm596_vm9, %vm605_vm10  ;;  %vm1205_vm9 = vcmask 191616   ;;  %vm1401_vm10 = vcmask 261312  }
  0x20   : > { %468 = vadd.xlane.f32.xlu1 %v467_v14  ;;  %vm612_vm15 = vmand %vm586_vm11, %vm594_vm5  ;;  %vm698_vm5 = vcmask 224256   ;;  %vm1405_vm11 = vcmask 257216  }
  0x21   : > { %vm615_vm1 = vmand %vm589_vm12, %vm603_vm7  ;;  %vm4644_vm12 = vcmask 261120  }
  0x22   : > { %vm613_vm3 = vmand %vm587_vm13, %vm609_vm14  ;;  %v4187_v7 = vsel %vm615_vm1, 0.0, %v4015_v3  ;;  %vm4649_vm1 = vcmask 257024  }
  0x23   : > { %v4189_v8 = vsel %vm613_vm3, 0.0, %v4015_v3  ;;  %vm803_vm3 = vcmask 60416   ;;  %vm4645_vm13 = vmmov %vm4644_vm12 }
  0x24   : > { %vm4646_vm14 = vmmov %vm4644_vm12 }
  0xa8   : > { %v459_v19 = vpop.xlane.xlu0 %458 }
  0xa9   : > { %v465_v18 = vpop.xlane.xlu1 %464  ;;  %v471_v21 = vmul.f32 0.03125, %v459_v19 }
  0xaa   : > { %v473_v20 = vmul.f32 0.03125, %v465_v18 }
  0xab   : > { %v475_v23 = vadd.f32 1e-06, %v471_v21 }
  0xac   : > { %v477_v22 = vadd.f32 1e-06, %v473_v20  ;;  %v462_v25 = vpop.xlane.xlu0 %461 }
  0xad   : > { %v469_v24 = vpop.xlane.xlu1 %468  ;;  %v472_v27 = vmul.f32 0.03125, %v462_v25 }
  0xae   : > { %3810 = vrsqrt.f32 %v477_v22  ;;  %v474_v26 = vmul.f32 0.03125, %v469_v24 }
  0xaf   : > { %3812 = vrsqrt.f32 %v475_v23  ;;  %v476_v29 = vadd.f32 1e-06, %v472_v27 }
  0xb0   : > { %v478_v28 = vadd.f32 1e-06, %v474_v26 }
  0xb2   : > { %3814 = vrsqrt.f32 %v478_v28 }
  0xb3   : > { %3816 = vrsqrt.f32 %v476_v29 }
  0xb8   : > { %v3811_v30 = vpop.eup %3810 }
  0xb9   : > { %v3813_v31 = vpop.eup %3812  ;;  %v485_v32 = vmul.f32 %v3811_v30, %v450_v4  ;;  %v4184_v4 = vsel %vm612_vm15, 0.0, %v4015_v3  ;;  %vm4647_vm15 = vmmov %vm4644_vm12 }
  0xba   : > { %v483_v34 = vmul.f32 %v3813_v31, %v448_v5 }
  0xbb   : > { %v496_v39 = vmul.f32 %v3272_v35, %v485_v32 }
  0xbc   : > { %v3815_v33 = vpop.eup %3814  ;;  %v494_v41 = vmul.f32 %v3272_v35, %v483_v34 }
  0xbd   : > { %v3817_v36 = vpop.eup %3816  ;;  %v486_v37 = vmul.f32 %v3815_v33, %v451_v6 }
  0xbe   : > { %v484_v38 = vmul.f32 %v3817_v36, %v449_v10 }
  0xbf   : > { %v497_v40 = vmul.f32 %v3272_v35, %v486_v37 }
  0xc0   : > { %v495_v42 = vmul.f32 %v3272_v35, %v484_v38 }
  0xc1   : > { %v499_v43 = vpack.c.bf16 %v497_v40, %v496_v39 }
  0xc2   : > { %v498_v44 = vpack.c.bf16 %v495_v42, %v494_v41 }
  0xc4   : > { %3541 = vmatprep.mubr.msk.bf16.mxu0 %vm4643_vm2, %v498_v44 }
  0xc5   : > { %3542 = vmatmul.mubr.msk.bf16.vlgmr.msra.gmra.mrb[0].mxu0 %vm4643_vm2, %v499_v43  ;;  %vm614_vm2 = vmand %vm588_vm0, %vm603_vm7  ;;  %vm1201_vm7 = vcmask 195712  }
  0xc6   : > { %v4192_v11 = vsel %vm614_vm2, 0.0, %v4015_v3  ;;  %vm747_vm2 = vcmask 1045504   ;;  %vm4648_vm0 = vmmov %vm4644_vm12 }
 0x198   : > { %v3543_v45 = vpop.f32.mrb[0].mxu0 }
 0x199   : > { %v556_v46 = vpop.f32.mrb[1].mxu0  ;;  %v573_v48 = vmul.f32 0.35355338, %v3543_v45 }
 0x19a   : > { %v3544_v47 = vpop.f32.mrb[2].mxu0  ;;  %v571_v52 = vmul.f32 0.35355338, %v556_v46 }
 0x19b   : > { %v574_v49 = vmul.f32 0.35355338, %v3544_v47  ;;  %v4158_v50 = vpack.c.bf16 %v3544_v47, %v3543_v45  ;;  %v559_v51 = vpop.f32.mrb[3].mxu0 }
 0x19c   : > { %v572_v53 = vmul.f32 0.35355338, %v559_v51  ;;  %v4160_v54 = vpack.c.bf16 %v559_v51, %v556_v46 }
 0x19d   : > { %v4162_v55 = vpack.c.bf16 %v574_v49, %v573_v48  ;;  %624 = vrot.lane.b32.xlu1 %v4158_v50, %s4014_s18 }
 0x19e   : > { %v4165_v56 = vpack.c.bf16 %v572_v53, %v571_v52  ;;  %622 = vrot.lane.b32.xlu0 %v4160_v54, %s4014_s18  ;;  %s4028_s18 = smov 24  }
 0x1a0   : > { %3549 = vmatprep.mubr.msk.bf16.mxu1 %vm626_vm4, %v4165_v56 }
 0x20f   : > { %v625_v59 = vpop.permute.xlu1 %624 }
 0x210   : > { %v623_v57 = vpop.permute.xlu0 %622  ;;  %v637_v60 = vsel %vm626_vm4, %v625_v59, 0 }
 0x211   : > { %3749 = vmatprep.subr.msk.bf16.mxu1 %vm626_vm4, %v623_v57  ;;  %v634_v58 = vsel %vm626_vm4, %v623_v57, 0 }
 0x212   : > { %3546 = vmatpush3.bf16.xpose.msra.mxu1 %v634_v58 }
 0x213   : > { %3750 = vmatprep.subr.msk.bf16.mxu1 %vm626_vm4, %v625_v59 }
 0x21a   : > { %3548 = vmatpush3.bf16.xpose.msra.mxu1 %v637_v60 }
 0x221   : > { %3550 = vmatmul.mubr.msk.bf16.vlgmr.msra.gmra.mrb[0].mxu1 %vm626_vm4, %v4162_v55 }
 0x2f4   : > { %v3551_v5 = vpop.f32.mrb[0].mxu1 }
 0x2f5   : > { %v673_v6 = vpop.f32.mrb[1].mxu1  ;;  %v682_v16 = vadd.f32 %v3551_v5, %v4192_v11 }
 0x2f6   : > { %v674_v9 = vadd.f32 %v673_v6, %v4184_v4  ;;  %v3552_v10 = vpop.f32.mrb[2].mxu1 }
 0x2f7   : > { %v676_v12 = vpop.f32.mrb[3].mxu1  ;;  %v685_v13 = vadd.f32 %v3552_v10, %v4187_v7  ;;  %v695_v19 = vsel %vm688_vm6, %v682_v16, -inf }
 0x2f8   : > { %v677_v14 = vadd.f32 %v676_v12, %v4189_v8  ;;  %v689_v15 = vsel %vm688_vm6, %v674_v9, -inf }
 0x2f9   : > { %690 = vmax.xlane.f32.xlu1 %v689_v15  ;;  %v699_v18 = vsel %vm698_vm5, %v685_v13, -inf }
 0x2fa   : > { %v692_v17 = vsel %vm688_vm6, %v677_v14, -inf }
 0x2fb   : > { %693 = vmax.xlane.f32.xlu0 %v692_v17 }
 0x2fd   : > { %700 = vmax.xlane.f32.xlu1 %v699_v18 }
 0x2ff   : > { %696 = vmax.xlane.f32.xlu0 %v695_v19 }
 0x30e   : > { %738 = vrot.lane.b32.xlu1 %v4158_v50, %s4016_s16 }
 0x386   : > { %v691_v20 = vpop.xlane.xlu1 %690 }
 0x387   : > { %v702_v24 = vsub.f32 %v674_v9, %v691_v20 }
 0x388   : > { %v694_v21 = vpop.xlane.xlu0 %693 }
 0x389   : > { %v703_v22 = vsub.f32 %v677_v14, %v694_v21  ;;  %v706_v30 = vmul.f32 1.442695, %v702_v24 }
 0x38a   : > { %v701_v23 = vpop.xlane.xlu1 %700 }
 0x38b   : > { %v705_v25 = vsub.f32 %v685_v13, %v701_v23  ;;  %v708_v26 = vmul.f32 1.442695, %v703_v22 }
 0x38c   : > { %v697_v27 = vpop.xlane.xlu0 %696 }
 0x38d   : > { %v712_v28 = vmul.f32 1.442695, %v705_v25  ;;  %v704_v29 = vsub.f32 %v682_v16, %v697_v27 }
 0x38e   : > { %v739_v40 = vpop.permute.xlu1 %738 }
 0x38f   : > { %3818 = vpow2.f32 %v712_v28  ;;  %v710_v31 = vmul.f32 1.442695, %v704_v29  ;;  %v749_v48 = vsel %vm747_vm2, %v739_v40, 0 }
 0x390   : > { %3820 = vpow2.f32 %v708_v26 }
 0x391   : > { %3822 = vpow2.f32 %v710_v31 }
 0x392   : > { %3824 = vpow2.f32 %v706_v30 }
 0x399   : > { %v3819_v32 = vpop.eup %3818 }
 0x39a   : > { %v3821_v33 = vpop.eup %3820  ;;  %v723_v34 = vsel %vm698_vm5, %v3819_v32, 0.0 }
 0x39b   : > { %v3823_v35 = vpop.eup %3822  ;;  %724 = vadd.xlane.f32.xlu1 %v723_v34  ;;  %v717_v38 = vsel %vm688_vm6, %v3821_v33, 0.0 }
 0x39c   : > { %v720_v36 = vsel %vm688_vm6, %v3823_v35, 0.0  ;;  %v3825_v37 = vpop.eup %3824 }
 0x39d   : > { %721 = vadd.xlane.f32.xlu0 %v720_v36  ;;  %v714_v39 = vsel %vm688_vm6, %v3825_v37, 0.0 }
 0x39f   : > { %718 = vadd.xlane.f32.xlu1 %v717_v38 }
 0x3a1   : > { %715 = vadd.xlane.f32.xlu0 %v714_v39 }
 0x3b0   : > { %811 = vrot.lane.b32.xlu1 %v4160_v54, %s4017_s17 }
 0x3b4   : > { %813 = vrot.lane.b32.xlu1 %v4158_v50, %s4017_s17 }
 0x3b7   : > { %736 = vrot.lane.b32.xlu0 %v4160_v54, %s4016_s16 }
 0x3b8   : > { %809 = vrot.lane.b32.xlu1 %v4162_v55, %s4018_s21 }
 0x3bb   : > { %807 = vrot.lane.b32.xlu0 %v4165_v56, %s4018_s21 }
 0x428   : > { %v725_v41 = vpop.xlane.xlu1 %724 }
 0x42a   : > { %v722_v42 = vpop.xlane.xlu0 %721 }
 0x42b   : > { %3826 = vrcp.f32 %v722_v42 }
 0x42c   : > { %v719_v43 = vpop.xlane.xlu1 %718 }
 0x42d   : > { %3828 = vrcp.f32 %v719_v43 }
 0x42e   : > { %3830 = vrcp.f32 %v725_v41  ;;  %v716_v44 = vpop.xlane.xlu0 %715 }
 0x42f   : > { %3832 = vrcp.f32 %v716_v44 }
 0x430   : > { %v812_v51 = vpop.permute.xlu1 %811 }
 0x431   : > { %v822_v0 = vsel %vm626_vm4, %v812_v51, 0 }
 0x432   : > { %v737_v45 = vpop.permute.xlu0 %736 }
 0x433   : > { %3553 = vmatprep.subr.bf16.mxu0 %v737_v45 }
 0x434   : > { %3554 = vmatpush3.bf16.msra.mxu0 %v737_v45  ;;  %v814_v1 = vpop.permute.xlu1 %813 }
 0x435   : > { %3751 = vmatprep.subr.msk.bf16.mxu0 %vm747_vm2, %v739_v40  ;;  %v3827_v46 = vpop.eup %3826  ;;  %v825_v2 = vsel %vm626_vm4, %v814_v1, 0 }
 0x436   : > { %v732_v53 = vmul.f32 %v3827_v46, %v3823_v35  ;;  %v808_v63 = vpop.permute.xlu0 %807 }
 0x437   : > { %v3829_v47 = vpop.eup %3828 }
 0x438   : > { %v3831_v49 = vpop.eup %3830  ;;  %3556 = vmatpush3.bf16.msra.mxu0 %v749_v48  ;;  %v731_v58 = vmul.f32 %v3829_v47, %v3821_v33  ;;  %v810_v3 = vpop.permute.xlu1 %809 }
 0x439   : > { %v3833_v52 = vpop.eup %3832  ;;  %3752 = vmatprep.subr.msk.bf16.mxu0 %vm626_vm4, %v812_v51  ;;  %v733_v59 = vmul.f32 %v3831_v49, %v3819_v32 }
 0x43a   : > { %v730_v57 = vmul.f32 %v3833_v52, %v3825_v37 }
 0x43b   : > { %v735_v61 = vpack.c.bf16 %v733_v59, %v732_v53 }
 0x43c   : > { %v734_v60 = vpack.c.bf16 %v731_v58, %v730_v57 }
 0x43e   : > { %3557 = vmatprep.mubr.msk.bf16.mxu0 %vm688_vm6, %v734_v60 }
 0x43f   : > { %3558 = vmatmul.mubr.msk.bf16.vlgmr.msra.gmra.mrb[4].mxu0 %vm688_vm6, %v735_v61 }
 0x440   : > { %3565 = vmatprep.mubr.msk.bf16.mxu0 %vm626_vm4, %v808_v63 }
 0x441   : > { %3562 = vmatpush3.bf16.xpose.msra.mxu0 %v822_v0 }
 0x442   : > { %3753 = vmatprep.subr.msk.bf16.mxu0 %vm626_vm4, %v814_v1 }
 0x449   : > { %3564 = vmatpush3.bf16.xpose.msra.mxu0 %v825_v2 }
 0x450   : > { %3566 = vmatmul.mubr.msk.bf16.vlgmr.msra.gmra.mrb[8].mxu0 %vm626_vm4, %v810_v3 }
 0x512   : > { %v3559_v5 = vpop.f32.mrb[4].mxu0 }
 0x513   : > { %802 = vst.msk [vmem:[#allocation2 + $0x10] sm:$0xff] %vm626_vm4, %v3559_v5  ;;  %v785_v6 = vpop.f32.mrb[5].mxu0 }
 0x514   : > { %800 = vst.msk [vmem:[#allocation2] sm:$0xff] %vm626_vm4, %v785_v6  ;;  %v3560_v9 = vpop.f32.mrb[6].mxu0 }
 0x515   : > { %804 = vst.msk [vmem:[#allocation2 + $0x18] sm:$0xf] %vm803_vm3, %v3560_v9  ;;  %v788_v10 = vpop.f32.mrb[7].mxu0  ;;  %vm4652_vm3 = vmmov %vm4648_vm0 }
 0x516   : > { %801 = vst.msk [vmem:[#allocation2 + $0x8] sm:$0xff] %vm626_vm4, %v788_v10 }
 0x523   : > { %v3567_v12 = vpop.f32.mrb[8].mxu0 }
 0x524   : > { %v861_v13 = vpop.f32.mrb[9].mxu0  ;;  %v870_v17 = vadd.f32 %v3567_v12, %v4192_v11 }
 0x525   : > { %v862_v14 = vadd.f32 %v861_v13, %v4184_v4  ;;  %v3568_v15 = vpop.f32.mrb[10].mxu0 }
 0x526   : > { %v864_v16 = vpop.f32.mrb[11].mxu0  ;;  %v873_v21 = vadd.f32 %v3568_v15, %v4187_v7  ;;  %v882_v22 = vsel %vm688_vm6, %v870_v17, -inf }
 0x527   : > { %v865_v18 = vadd.f32 %v864_v16, %v4189_v8  ;;  %v876_v19 = vsel %vm688_vm6, %v862_v14, -inf }
 0x528   : > { %877 = vmax.xlane.f32.xlu0 %v876_v19  ;;  %v885_v23 = vsel %vm698_vm5, %v873_v21, -inf }
 0x529   : > { %v879_v20 = vsel %vm688_vm6, %v865_v18, -inf }
 0x52a   : > { %880 = vmax.xlane.f32.xlu1 %v879_v20 }
 0x52c   : > { %883 = vmax.xlane.f32.xlu0 %v882_v22 }
 0x530   : > { %886 = vmax.xlane.f32.xlu0 %v885_v23 }
 0x53b   : > { %924 = vrot.lane.b32.xlu1 %v4158_v50, %s4019_s23 }
 0x5b5   : > { %v878_v24 = vpop.xlane.xlu0 %877 }
 0x5b6   : > { %v888_v25 = vsub.f32 %v862_v14, %v878_v24 }
 0x5b7   : > { %v881_v26 = vpop.xlane.xlu1 %880 }
 0x5b8   : > { %v892_v29 = vmul.f32 1.442695, %v888_v25  ;;  %v889_v30 = vsub.f32 %v865_v18, %v881_v26 }
 0x5b9   : > { %v884_v27 = vpop.xlane.xlu0 %883 }
 0x5ba   : > { %v890_v28 = vsub.f32 %v870_v17, %v884_v27  ;;  %v894_v34 = vmul.f32 1.442695, %v889_v30 }
 0x5bb   : > { %v925_v44 = vpop.permute.xlu1 %924 }
 0x5bc   : > { %v896_v31 = vmul.f32 1.442695, %v890_v28  ;;  %v934_v51 = vsel %vm747_vm2, %v925_v44, 0 }
 0x5bd   : > { %v887_v32 = vpop.xlane.xlu0 %886 }
 0x5be   : > { %3834 = vpow2.f32 %v896_v31  ;;  %v891_v33 = vsub.f32 %v873_v21, %v887_v32 }
 0x5bf   : > { %3836 = vpow2.f32 %v892_v29 }
 0x5c0   : > { %v898_v35 = vmul.f32 1.442695, %v891_v33 }
 0x5c2   : > { %3838 = vpow2.f32 %v898_v35 }
 0x5c3   : > { %3840 = vpow2.f32 %v894_v34 }
 0x5c8   : > { %v3835_v36 = vpop.eup %3834 }
 0x5c9   : > { %v906_v37 = vsel %vm688_vm6, %v3835_v36, 0.0  ;;  %v3837_v38 = vpop.eup %3836 }
 0x5ca   : > { %907 = vadd.xlane.f32.xlu0 %v906_v37  ;;  %v900_v40 = vsel %vm688_vm6, %v3837_v38, 0.0 }
 0x5cc   : > { %v3839_v39 = vpop.eup %3838 }
 0x5cd   : > { %v909_v41 = vsel %vm698_vm5, %v3839_v39, 0.0  ;;  %v3841_v42 = vpop.eup %3840 }
 0x5ce   : > { %901 = vadd.xlane.f32.xlu0 %v900_v40  ;;  %910 = vadd.xlane.f32.xlu1 %v909_v41  ;;  %v903_v43 = vsel %vm688_vm6, %v3841_v42, 0.0 }
 0x5d2   : > { %904 = vadd.xlane.f32.xlu1 %v903_v43 }
 0x5e3   : > { %1011 = vrot.lane.b32.xlu1 %v4160_v54, %s4020_s24 }
 0x5e4   : > { %922 = vrot.lane.b32.xlu0 %v4160_v54, %s4019_s23 }
 0x5e7   : > { %1013 = vrot.lane.b32.xlu1 %v4158_v50, %s4020_s24 }
 0x5e8   : > { %1007 = vrot.lane.b32.xlu0 %v4165_v56, %s4021_s26 }
 0x5eb   : > { %1009 = vrot.lane.b32.xlu1 %v4162_v55, %s4021_s26 }
 0x657   : > { %v908_v45 = vpop.xlane.xlu0 %907 }
 0x65b   : > { %v911_v46 = vpop.xlane.xlu1 %910  ;;  %v902_v47 = vpop.xlane.xlu0 %901 }
 0x65c   : > { %3842 = vrcp.f32 %v911_v46 }
 0x65d   : > { %3844 = vrcp.f32 %v902_v47 }
 0x65e   : > { %3846 = vrcp.f32 %v908_v45 }
 0x65f   : > { %v905_v48 = vpop.xlane.xlu1 %904  ;;  %v923_v49 = vpop.permute.xlu0 %922 }
 0x660   : > { %3848 = vrcp.f32 %v905_v48  ;;  %3569 = vmatprep.subr.bf16.mxu1 %v923_v49 }
 0x661   : > { %3570 = vmatpush3.bf16.msra.mxu1 %v923_v49 }
 0x662   : > { %3754 = vmatprep.subr.msk.bf16.mxu1 %vm747_vm2, %v925_v44 }
 0x663   : > { %v1012_v52 = vpop.permute.xlu1 %1011  ;;  %v1008_v5 = vpop.permute.xlu0 %1007 }
 0x664   : > { %v1022_v3 = vsel %vm626_vm4, %v1012_v52, 0 }
 0x665   : > { %3572 = vmatpush3.bf16.msra.mxu1 %v934_v51 }
 0x666   : > { %3755 = vmatprep.subr.msk.bf16.mxu1 %vm626_vm4, %v1012_v52  ;;  %v3843_v53 = vpop.eup %3842 }
 0x667   : > { %v3845_v57 = vpop.eup %3844  ;;  %v919_v60 = vmul.f32 %v3843_v53, %v3839_v39  ;;  %v1014_v6 = vpop.permute.xlu1 %1013 }
 0x668   : > { %v3847_v58 = vpop.eup %3846  ;;  %v916_v61 = vmul.f32 %v3845_v57, %v3837_v38  ;;  %v1025_v9 = vsel %vm626_vm4, %v1014_v6, 0 }
 0x669   : > { %v918_v0 = vmul.f32 %v3847_v58, %v3835_v36 }
 0x66a   : > { %v3849_v59 = vpop.eup %3848 }
 0x66b   : > { %v917_v63 = vmul.f32 %v3849_v59, %v3841_v42  ;;  %v921_v2 = vpack.c.bf16 %v919_v60, %v918_v0  ;;  %v1010_v10 = vpop.permute.xlu1 %1009 }
 0x66d   : > { %v920_v1 = vpack.c.bf16 %v917_v63, %v916_v61 }
 0x66f   : > { %3573 = vmatprep.mubr.msk.bf16.mxu1 %vm688_vm6, %v920_v1 }
 0x670   : > { %3574 = vmatmul.mubr.msk.bf16.vlgmr.msra.gmra.mrb[4].mxu1 %vm688_vm6, %v921_v2 }
 0x671   : > { %3578 = vmatpush3.bf16.xpose.msra.mxu1 %v1022_v3  ;;  %3581 = vmatprep.mubr.msk.bf16.mxu1 %vm626_vm4, %v1008_v5 }
 0x672   : > { %3756 = vmatprep.subr.msk.bf16.mxu1 %vm626_vm4, %v1014_v6 }
 0x679   : > { %3580 = vmatpush3.bf16.xpose.msra.mxu1 %v1025_v9 }
 0x680   : > { %3582 = vmatmul.mubr.msk.bf16.vlgmr.msra.gmra.mrb[8].mxu1 %vm626_vm4, %v1010_v10 }
 0x743   : > { %v4256_v12 = vpop.f32.mrb[4].mxu1 }
 0x744   : > { %v4258_v13 = vpop.f32.mrb[5].mxu1 }
 0x745   : > { %v4260_v14 = vpop.f32.mrb[6].mxu1 }
 0x746   : > { %v4262_v15 = vpop.f32.mrb[7].mxu1 }
 0x753   : > { %v3583_v16 = vpop.f32.mrb[8].mxu1 }
 0x754   : > { %v1061_v17 = vpop.f32.mrb[9].mxu1  ;;  %v1070_v21 = vadd.f32 %v3583_v16, %v4192_v11 }
 0x755   : > { %v1062_v18 = vadd.f32 %v1061_v17, %v4184_v4  ;;  %v3584_v19 = vpop.f32.mrb[10].mxu1 }
 0x756   : > { %v1064_v20 = vpop.f32.mrb[11].mxu1  ;;  %v1073_v25 = vadd.f32 %v3584_v19, %v4187_v7  ;;  %v1082_v26 = vsel %vm688_vm6, %v1070_v21, -inf }
 0x757   : > { %v1065_v22 = vadd.f32 %v1064_v20, %v4189_v8  ;;  %v1076_v23 = vsel %vm688_vm6, %v1062_v18, -inf }
 0x758   : > { %1077 = vmax.xlane.f32.xlu0 %v1076_v23  ;;  %v1085_v27 = vsel %vm698_vm5, %v1073_v25, -inf }
 0x759   : > { %v1079_v24 = vsel %vm688_vm6, %v1065_v22, -inf }
 0x75a   : > { %1080 = vmax.xlane.f32.xlu1 %v1079_v24 }
 0x75c   : > { %1083 = vmax.xlane.f32.xlu0 %v1082_v26 }
 0x760   : > { %1086 = vmax.xlane.f32.xlu0 %v1085_v27 }
 0x76b   : > { %1124 = vrot.lane.b32.xlu1 %v4158_v50, %s4022_s19 }
 0x7e5   : > { %v1078_v28 = vpop.xlane.xlu0 %1077 }
 0x7e6   : > { %v1088_v29 = vsub.f32 %v1062_v18, %v1078_v28 }
 0x7e7   : > { %v1081_v30 = vpop.xlane.xlu1 %1080 }
 0x7e8   : > { %v1092_v33 = vmul.f32 1.442695, %v1088_v29  ;;  %v1089_v34 = vsub.f32 %v1065_v22, %v1081_v30 }
 0x7e9   : > { %v1084_v31 = vpop.xlane.xlu0 %1083 }
 0x7ea   : > { %v1090_v32 = vsub.f32 %v1070_v21, %v1084_v31  ;;  %v1094_v38 = vmul.f32 1.442695, %v1089_v34 }
 0x7eb   : > { %v1125_v48 = vpop.permute.xlu1 %1124 }
 0x7ec   : > { %v1096_v35 = vmul.f32 1.442695, %v1090_v32  ;;  %v1134_v58 = vsel %vm747_vm2, %v1125_v48, 0 }
 0x7ed   : > { %v1087_v36 = vpop.xlane.xlu0 %1086 }
 0x7ee   : > { %3850 = vpow2.f32 %v1096_v35  ;;  %v1091_v37 = vsub.f32 %v1073_v25, %v1087_v36 }
 0x7ef   : > { %3852 = vpow2.f32 %v1092_v33 }
 0x7f0   : > { %v1098_v39 = vmul.f32 1.442695, %v1091_v37 }
 0x7f2   : > { %3854 = vpow2.f32 %v1098_v39 }
 0x7f3   : > { %3856 = vpow2.f32 %v1094_v38 }
 0x7f8   : > { %v3851_v40 = vpop.eup %3850 }
 0x7f9   : > { %v1106_v41 = vsel %vm688_vm6, %v3851_v40, 0.0  ;;  %v3853_v42 = vpop.eup %3852 }
 0x7fa   : > { %1107 = vadd.xlane.f32.xlu0 %v1106_v41  ;;  %v1100_v44 = vsel %vm688_vm6, %v3853_v42, 0.0 }
 0x7fc   : > { %v3855_v43 = vpop.eup %3854 }
 0x7fd   : > { %v1109_v45 = vsel %vm698_vm5, %v3855_v43, 0.0  ;;  %v3857_v46 = vpop.eup %3856 }
 0x7fe   : > { %1101 = vadd.xlane.f32.xlu0 %v1100_v44  ;;  %1110 = vadd.xlane.f32.xlu1 %v1109_v45  ;;  %v1103_v47 = vsel %vm688_vm6, %v3857_v46, 0.0 }
 0x802   : > { %1104 = vadd.xlane.f32.xlu1 %v1103_v47 }
 0x813   : > { %1211 = vrot.lane.b32.xlu1 %v4160_v54, %s4023_s27 }
 0x814   : > { %1122 = vrot.lane.b32.xlu0 %v4160_v54, %s4022_s19 }
 0x817   : > { %1213 = vrot.lane.b32.xlu1 %v4158_v50, %s4023_s27 }
 0x818   : > { %1207 = vrot.lane.b32.xlu0 %v4165_v56, %s4024_s29 }
 0x81b   : > { %1209 = vrot.lane.b32.xlu1 %v4162_v55, %s4024_s29 }
 0x887   : > { %v1108_v49 = vpop.xlane.xlu0 %1107 }
 0x88b   : > { %v1111_v51 = vpop.xlane.xlu1 %1110  ;;  %v1102_v52 = vpop.xlane.xlu0 %1101 }
 0x88c   : > { %3858 = vrcp.f32 %v1111_v51 }
 0x88d   : > { %3860 = vrcp.f32 %v1102_v52 }
 0x88e   : > { %3862 = vrcp.f32 %v1108_v49 }
 0x88f   : > { %v1105_v53 = vpop.xlane.xlu1 %1104  ;;  %v1123_v57 = vpop.permute.xlu0 %1122 }
 0x890   : > { %3864 = vrcp.f32 %v1105_v53  ;;  %3585 = vmatprep.subr.bf16.mxu0 %v1123_v57 }
 0x891   : > { %3586 = vmatpush3.bf16.msra.mxu0 %v1123_v57 }
 0x892   : > { %3757 = vmatprep.subr.msk.bf16.mxu0 %vm747_vm2, %v1125_v48 }
 0x893   : > { %v1212_v59 = vpop.permute.xlu1 %1211  ;;  %v1208_v9 = vpop.permute.xlu0 %1207 }
 0x894   : > { %v1222_v6 = vsel %vm626_vm4, %v1212_v59, 0 }
 0x895   : > { %3588 = vmatpush3.bf16.msra.mxu0 %v1134_v58 }
 0x896   : > { %3758 = vmatprep.subr.msk.bf16.mxu0 %vm626_vm4, %v1212_v59  ;;  %v3859_v55 = vpop.eup %3858 }
 0x897   : > { %v3861_v56 = vpop.eup %3860  ;;  %v1119_v63 = vmul.f32 %v3859_v55, %v3855_v43  ;;  %v1214_v10 = vpop.permute.xlu1 %1213 }
 0x898   : > { %v3863_v60 = vpop.eup %3862  ;;  %v1116_v0 = vmul.f32 %v3861_v56, %v3853_v42  ;;  %v1225_v16 = vsel %vm626_vm4, %v1214_v10, 0 }
 0x899   : > { %v1118_v2 = vmul.f32 %v3863_v60, %v3851_v40 }
 0x89a   : > { %v3865_v61 = vpop.eup %3864 }
 0x89b   : > { %v1117_v1 = vmul.f32 %v3865_v61, %v3857_v46  ;;  %v1121_v5 = vpack.c.bf16 %v1119_v63, %v1118_v2  ;;  %v1210_v17 = vpop.permute.xlu1 %1209 }
 0x89d   : > { %v1120_v3 = vpack.c.bf16 %v1117_v1, %v1116_v0 }
 0x89f   : > { %3589 = vmatprep.mubr.msk.bf16.mxu0 %vm688_vm6, %v1120_v3 }
 0x8a0   : > { %3590 = vmatmul.mubr.msk.bf16.vlgmr.msra.gmra.mrb[12].mxu0 %vm688_vm6, %v1121_v5 }
 0x8a1   : > { %3594 = vmatpush3.bf16.xpose.msra.mxu0 %v1222_v6  ;;  %3597 = vmatprep.mubr.msk.bf16.mxu0 %vm626_vm4, %v1208_v9 }
 0x8a2   : > { %3759 = vmatprep.subr.msk.bf16.mxu0 %vm626_vm4, %v1214_v10 }
 0x8a9   : > { %3596 = vmatpush3.bf16.xpose.msra.mxu0 %v1225_v16  ;;  %v3802_v16 = vld [vmem:[%s4115_s25] sm:$0xff]  }
 0x8b0   : > { %3598 = vmatmul.mubr.msk.bf16.vlgmr.msra.gmra.mrb[16].mxu0 %vm626_vm4, %v1210_v17  ;;  %vm1001_vm4 = vcmask 130112   ;;  %v3803_v17 = vld [vmem:[%s4115_s25 + $0x8] sm:$0xff]  }
 0x973   : > { %v3591_v18 = vpop.f32.mrb[12].mxu0 }
 0x974   : > { %v1170_v19 = vpop.f32.mrb[13].mxu0 }
 0x975   : > { %v3592_v20 = vpop.f32.mrb[14].mxu0 }
 0x976   : > { %v1173_v21 = vpop.f32.mrb[15].mxu0 }
 0x983   : > { %v3599_v22 = vpop.f32.mrb[16].mxu0 }
 0x984   : > { %v1261_v23 = vpop.f32.mrb[17].mxu0  ;;  %v1270_v27 = vadd.f32 %v3599_v22, %v4192_v11 }
 0x985   : > { %v1262_v24 = vadd.f32 %v1261_v23, %v4184_v4  ;;  %v3600_v25 = vpop.f32.mrb[18].mxu0 }
 0x986   : > { %v1264_v26 = vpop.f32.mrb[19].mxu0  ;;  %v1273_v31 = vadd.f32 %v3600_v25, %v4187_v7  ;;  %v1282_v32 = vsel %vm688_vm6, %v1270_v27, -inf }
 0x987   : > { %v1265_v28 = vadd.f32 %v1264_v26, %v4189_v8  ;;  %v1276_v29 = vsel %vm688_vm6, %v1262_v24, -inf }
 0x988   : > { %1277 = vmax.xlane.f32.xlu0 %v1276_v29  ;;  %v1285_v33 = vsel %vm698_vm5, %v1273_v31, -inf }
 0x989   : > { %v1279_v30 = vsel %vm688_vm6, %v1265_v28, -inf }
 0x98a   : > { %1280 = vmax.xlane.f32.xlu1 %v1279_v30 }
 0x98c   : > { %1283 = vmax.xlane.f32.xlu0 %v1282_v32 }
 0x990   : > { %1286 = vmax.xlane.f32.xlu0 %v1285_v33 }
 0xa15   : > { %v1278_v4 = vpop.xlane.xlu0 %1277 }
 0xa16   : > { %v1288_v34 = vsub.f32 %v1262_v24, %v1278_v4  ;;  %v3906_v4 = vld [vmem:[#allocation3 + $0x10] sm:$0xff] }
 0xa17   : > { %v1281_v35 = vpop.xlane.xlu1 %1280 }
 0xa18   : > { %v1292_v8 = vmul.f32 1.442695, %v1288_v34  ;;  %v1289_v37 = vsub.f32 %v1265_v28, %v1281_v35  ;;  %v3907_v35 = vld [vmem:[#allocation3] sm:$0xff] }
 0xa19   : > { %v1284_v11 = vpop.xlane.xlu0 %1283 }
 0xa1a   : > { %v1290_v36 = vsub.f32 %v1270_v27, %v1284_v11  ;;  %v1294_v41 = vmul.f32 1.442695, %v1289_v37  ;;  %v3908_v37 = vld [vmem:[#allocation3 + $0x8] sm:$0xff] }
 0xa1c   : > { %v1296_v38 = vmul.f32 1.442695, %v1290_v36 }
 0xa1d   : > { %v1287_v39 = vpop.xlane.xlu0 %1286 }
 0xa1e   : > { %3866 = vpow2.f32 %v1296_v38  ;;  %v1291_v40 = vsub.f32 %v1273_v31, %v1287_v39 }
 0xa1f   : > { %3868 = vpow2.f32 %v1292_v8 }
 0xa20   : > { %v1298_v7 = vmul.f32 1.442695, %v1291_v40  ;;  %v3909_v40 = vld [vmem:[#allocation3 + $0x18] sm:$0xf] }
 0xa22   : > { %3870 = vpow2.f32 %v1298_v7 }
 0xa23   : > { %3872 = vpow2.f32 %v1294_v41 }
 0xa28   : > { %v3867_v42 = vpop.eup %3866 }
 0xa29   : > { %v1306_v43 = vsel %vm688_vm6, %v3867_v42, 0.0  ;;  %v3869_v44 = vpop.eup %3868 }
 0xa2a   : > { %1307 = vadd.xlane.f32.xlu0 %v1306_v43  ;;  %v1300_v46 = vsel %vm688_vm6, %v3869_v44, 0.0 }
 0xa2c   : > { %v3871_v45 = vpop.eup %3870 }
 0xa2d   : > { %v1309_v47 = vsel %vm698_vm5, %v3871_v45, 0.0  ;;  %v3873_v48 = vpop.eup %3872  ;;  %vm4651_vm5 = vmmov %vm4648_vm0 }
 0xa2e   : > { %1301 = vadd.xlane.f32.xlu0 %v1300_v46  ;;  %1310 = vadd.xlane.f32.xlu1 %v1309_v47  ;;  %v1303_v49 = vsel %vm688_vm6, %v3873_v48, 0.0 }
 0xa32   : > { %1304 = vadd.xlane.f32.xlu1 %v1303_v49  ;;  %v3805_v49 = vld [vmem:[%s4124_s11 + $0x8] sm:$0xff]  }
 0xa43   : > { %1324 = vrot.lane.b32.xlu1 %v4158_v50, %s4025_s30 }
 0xa44   : > { %1322 = vrot.lane.b32.xlu0 %v4160_v54, %s4025_s30 }
 0xa47   : > { %989 = vrot.lane.b32.xlu1 %v4258_v13, %s4026_s22 }
 0xa48   : > { %993 = vrot.lane.b32.xlu0 %v4256_v12, %s4026_s22 }
 0xa4b   : > { %991 = vrot.lane.b32.xlu1 %v4262_v15, %s4026_s22 }
 0xa4c   : > { %1189 = vrot.lane.b32.xlu0 %v1170_v19, %s4027_s12 }
 0xa4f   : > { %995 = vrot.lane.b32.xlu1 %v4260_v14, %s4026_s22 }
 0xa50   : > { %1193 = vrot.lane.b32.xlu0 %v3591_v18, %s4027_s12 }
 0xa53   : > { %1191 = vrot.lane.b32.xlu1 %v1173_v21, %s4027_s12 }
 0xa57   : > { %1195 = vrot.lane.b32.xlu1 %v3592_v20, %s4027_s12 }
 0xab7   : > { %v1308_v50 = vpop.xlane.xlu0 %1307 }
 0xabb   : > { %v1311_v54 = vpop.xlane.xlu1 %1310  ;;  %v1302_v51 = vpop.xlane.xlu0 %1301 }
 0xabc   : > { %3874 = vrcp.f32 %v1311_v54 }
 0xabd   : > { %3876 = vrcp.f32 %v1302_v51 }
 0xabe   : > { %3878 = vrcp.f32 %v1308_v50 }
 0xabf   : > { %v1305_v13 = vpop.xlane.xlu1 %1304  ;;  %v1323_v52 = vpop.permute.xlu0 %1322 }
 0xac0   : > { %3880 = vrcp.f32 %v1305_v13  ;;  %3601 = vmatprep.subr.bf16.mxu1 %v1323_v52 }
 0xac1   : > { %3602 = vmatpush3.bf16.msra.mxu1 %v1323_v52 }
 0xac3   : > { %v1325_v12 = vpop.permute.xlu1 %1324  ;;  %v994_v15 = vpop.permute.xlu0 %993 }
 0xac4   : > { %v1334_v53 = vsel %vm747_vm2, %v1325_v12, 0  ;;  %1004 = vst.msk [vmem:[#allocation2 + $0x10] sm:$0xff] %vm1001_vm4, %v994_v15  ;;  %3760 = vmatprep.subr.msk.bf16.mxu1 %vm747_vm2, %v1325_v12  ;;  %vm1686_vm2 = vcmask 523264  }
 0xac5   : > { %3604 = vmatpush3.bf16.msra.mxu1 %v1334_v53 }
 0xac6   : > { %v3875_v14 = vpop.eup %3874  ;;  %3609 = vmatprep.subr.bf16.mxu1 %v3802_v16 }
 0xac7   : > { %v990_v57 = vpop.permute.xlu1 %989  ;;  %v1190_v58 = vpop.permute.xlu0 %1189  ;;  %v1319_v60 = vmul.f32 %v3875_v14, %v3871_v45 }
 0xac8   : > { %v3877_v59 = vpop.eup %3876  ;;  %1002 = vst.msk [vmem:[#allocation2] sm:$0xff] %vm1001_vm4, %v990_v57 }
 0xac9   : > { %v3879_v55 = vpop.eup %3878  ;;  %1202 = vst.msk [vmem:[#allocation2] sm:$0xff] %vm1201_vm7, %v1190_v58  ;;  %v1316_v0 = vmul.f32 %v3877_v59, %v3869_v44 }
 0xaca   : > { %v3881_v56 = vpop.eup %3880  ;;  %v1318_v2 = vmul.f32 %v3879_v55, %v3867_v42 }
 0xacb   : > { %v992_v61 = vpop.permute.xlu1 %991  ;;  %v1194_v63 = vpop.permute.xlu0 %1193  ;;  %v1317_v1 = vmul.f32 %v3881_v56, %v3873_v48  ;;  %v3804_v48 = vld [vmem:[%s4124_s11] sm:$0xff]  }
 0xacc   : > { %1003 = vst.msk [vmem:[#allocation2 + $0x8] sm:$0xff] %vm1001_vm4, %v992_v61  ;;  %v1321_v5 = vpack.c.bf16 %v1319_v60, %v1318_v2  ;;  %3617 = vmatprep.subr.bf16.mxu0 %v3804_v48  ;;  %v3297_v61 = vld [vmem:[%s422_s28] ss:$0 sm:$0xff]  ;;  %vm4653_vm4 = vmmov %vm4648_vm0 }
 0xacd   : > { %1204 = vst.msk [vmem:[#allocation2 + $0x10] sm:$0xff] %vm1201_vm7, %v1194_v63  ;;  %v1320_v3 = vpack.c.bf16 %v1317_v1, %v1316_v0  ;;  %3618 = vmatpush3.bf16.msra.mxu0 %v3804_v48 }
 0xace   : > { %3619 = vmatprep.subr.bf16.mxu0 %v3805_v49 }
 0xacf   : > { %v996_v6 = vpop.permute.xlu1 %995  ;;  %3605 = vmatprep.mubr.msk.bf16.mxu1 %vm688_vm6, %v1320_v3 }
 0xad0   : > { %1006 = vst.msk [vmem:[#allocation2 + $0x18] sm:$0xf] %vm1005_vm8, %v996_v6  ;;  %3606 = vmatmul.mubr.msk.bf16.vlgmr.msra.gmra.mrb[12].mxu1 %vm688_vm6, %v1321_v5  ;;  %vm4650_vm6 = vmmov %vm4648_vm0 }
 0xad1   : > { %3610 = vmatpush3.bf16.msra.mxu1 %v3802_v16  ;;  %3620 = vmatpush3.bf16.msra.mxu0 %v3805_v49  ;;  %vm4655_vm8 = vmmov %vm4648_vm0 }
 0xad2   : > { %3611 = vmatprep.subr.bf16.mxu1 %v3803_v17 }
 0xad3   : > { %v1192_v9 = vpop.permute.xlu1 %1191 }
 0xad4   : > { %1203 = vst.msk [vmem:[#allocation2 + $0x8] sm:$0xff] %vm1201_vm7, %v1192_v9  ;;  %vm4654_vm7 = vmmov %vm4649_vm1 }
 0xad5   : > { %3612 = vmatpush3.bf16.msra.mxu1 %v3803_v17 }
 0xad7   : > { %v1196_v10 = vpop.permute.xlu1 %1195 }
 0xad8   : > { %1206 = vst.msk [vmem:[#allocation2 + $0x18] sm:$0xf] %vm1205_vm9, %v1196_v10  ;;  %vm4656_vm9 = vcmask (!%p3312_p5), 261120  }
 0xba3   : > { %v3607_v18 = vpop.f32.mrb[12].mxu1 }
 0xba4   : > { %v1370_v19 = vpop.f32.mrb[13].mxu1 }
 0xba5   : > { %1389 = vrot.lane.b32.xlu0 %v1370_v19, %s4028_s18  ;;  %v3608_v20 = vpop.f32.mrb[14].mxu1  ;;  %v3807_v19 = vld [vmem:[%s4130_s20 + $0x8] sm:$0xff]  }
 0xba6   : > { %v1373_v21 = vpop.f32.mrb[15].mxu1 }
 0xba7   : > { %1391 = vrot.lane.b32.xlu1 %v1373_v21, %s4028_s18  ;;  %v3809_v21 = vld [vmem:[%s4130_s20 + $0x18] sm:$0xff]  }
 0xba9   : > { %1393 = vrot.lane.b32.xlu0 %v3607_v18, %s4028_s18  ;;  %v3806_v18 = vld [vmem:[%s4130_s20] sm:$0xff]  }
 0xbaa   : > { %3625 = vmatprep.subr.bf16.mxu1 %v3806_v18 }
 0xbab   : > { %1395 = vrot.lane.b32.xlu1 %v3608_v20, %s4028_s18  ;;  %v3808_v20 = vld [vmem:[%s4130_s20 + $0x10] sm:$0xff]  }
 0xc17   : > { %v1390_v22 = vpop.permute.xlu0 %1389 }
 0xc18   : > { %1402 = vst.msk [vmem:[#allocation2] sm:$0xff] %vm1401_vm10, %v1390_v22 }
 0xc19   : > { %v1392_v23 = vpop.permute.xlu1 %1391 }
 0xc1a   : > { %1403 = vst.msk [vmem:[#allocation2 + $0x8] sm:$0xff] %vm1401_vm10, %v1392_v23 }
 0xc1b   : > { %v1394_v24 = vpop.permute.xlu0 %1393 }
 0xc1c   : > { %1404 = vst.msk [vmem:[#allocation2 + $0x10] sm:$0xff] %vm1401_vm10, %v1394_v24  ;;  %vm4657_vm10 = vmmov (!%p3312_p5), %vm4656_vm9 }
 0xc1d   : > { %v1396_v25 = vpop.permute.xlu1 %1395 }
 0xc1e   : > { %1406 = vst.msk [vmem:[#allocation2 + $0x18] sm:$0xf] %vm1405_vm11, %v1396_v25  ;;  %vm4658_vm11 = vmmov (!%p3312_p5), %vm4656_vm9 }
 0xc1f   : > { %v1407_v26 = vld [vmem:[#allocation2] sm:$0xff] }
 0xc21   : > { %v1408_v27 = vld [vmem:[#allocation2 + $0x8] sm:$0xff] }
 0xc22   : > { %v1411_v28 = vpack.c.bf16 %v1408_v27, %v1407_v26 }
 0xc23   : > { %v1409_v29 = vld [vmem:[#allocation2 + $0x10] sm:$0xff] }
 0xc24   : > { %3613 = vmatprep.mubr.msk.bf16.mxu1 %vm4644_vm12, %v1411_v28  ;;  %vm4659_vm12 = vmmov (!%p3312_p5), %vm4656_vm9 }
 0xc25   : > { %v1410_v30 = vld [vmem:[#allocation2 + $0x18] sm:$0xf] }
 0xc26   : > { %v1412_v31 = vpack.c.bf16 %v1410_v30, %v1409_v29 }
 0xc28   : > { %3614 = vmatmul.mubr.msk.bf16.vlgmr.msra.gmra.mrb[16].mxu1 %vm4645_vm13, %v1412_v31  ;;  %vm4660_vm13 = vmmov (!%p3312_p5), %vm4656_vm9 }
 0xc29   : > { %3626 = vmatpush3.bf16.msra.mxu1 %v3806_v18  ;;  %v3925_v18 = vld [vmem:[%s4638_s7 + $0x78] sm:$0xff] (!%p3312_p5)  }
 0xc2a   : > { %3627 = vmatprep.subr.bf16.mxu1 %v3807_v19 }
 0xc2d   : > { %3628 = vmatpush3.bf16.msra.mxu1 %v3807_v19  ;;  %v3926_v19 = vld [vmem:[%s4638_s7 + $0x80] sm:$0xff] (!%p3312_p5)  }
 0xc2e   : > { %3629 = vmatprep.subr.bf16.mxu1 %v3808_v20 }
 0xc31   : > { %3630 = vmatpush3.bf16.msra.mxu1 %v3808_v20  ;;  %v3927_v20 = vld [vmem:[%s4638_s7 + $0x90] sm:$0xff] (!%p3312_p5)  }
 0xc32   : > { %3631 = vmatprep.subr.bf16.mxu1 %v3809_v21 }
 0xc35   : > { %3632 = vmatpush3.bf16.msra.mxu1 %v3809_v21  ;;  %v3928_v21 = vld [vmem:[%s4638_s7 + $0x88] sm:$0xff] (!%p3312_p5)  }
 0xcfb   : > { %v3615_v32 = vpop.f32.mrb[16].mxu1 }
 0xcfc   : > { %v1469_v33 = vpop.f32.mrb[17].mxu1  ;;  %v4330_v34 = vadd.f32 %v3906_v4, %v3615_v32 }
 0xcfd   : > { %v4332_v11 = vadd.f32 %v3907_v35, %v1469_v33  ;;  %v3616_v36 = vpop.f32.mrb[18].mxu1 }
 0xcfe   : > { %v1472_v8 = vpop.f32.mrb[19].mxu1  ;;  %v4338_v41 = vadd.f32 %v3909_v40, %v3616_v36  ;;  %v1490_v43 = vmul.f32 %v4330_v34, %v4330_v34 }
 0xcff   : > { %v4334_v38 = vadd.f32 %v3908_v37, %v1472_v8  ;;  %v1488_v39 = vmul.f32 %v4332_v11, %v4332_v11 }
 0xd00   : > { %v1498_v45 = vsel %vm4648_vm0, %v1490_v43, 0.0  ;;  %v1491_v46 = vmul.f32 %v4338_v41, %v4338_v41  ;;  %vm4663_vm0 = vmmov (!%p3312_p5), %vm4656_vm9 }
 0xd01   : > { %v1492_v7 = vsel %vm4646_vm14, %v1488_v39, 0.0  ;;  %v1489_v42 = vmul.f32 %v4334_v38, %v4334_v38  ;;  %vm4661_vm14 = vmmov (!%p3312_p5), %vm4656_vm9 }
 0xd02   : > { %1493 = vadd.xlane.f32.xlu0 %v1492_v7  ;;  %v1501_v47 = vsel %vm4649_vm1, %v1491_v46, 0.0  ;;  %vm4664_vm1 = vmmov (!%p3312_p5), %vm4663_vm0 }
 0xd03   : > { %v1495_v44 = vsel %vm4647_vm15, %v1489_v42, 0.0  ;;  %vm4662_vm15 = vmmov (!%p3312_p5), %vm4656_vm9 }
 0xd04   : > { %1496 = vadd.xlane.f32.xlu1 %v1495_v44 }
 0xd06   : > { %1499 = vadd.xlane.f32.xlu0 %v1498_v45 }
 0xd0a   : > { %1502 = vadd.xlane.f32.xlu0 %v1501_v47 }
 0xd8f   : > { %v1494_v50 = vpop.xlane.xlu0 %1493 }
 0xd90   : > { %v1504_v54 = vmul.f32 0.03125, %v1494_v50 }
 0xd91   : > { %v1497_v51 = vpop.xlane.xlu1 %1496 }
 0xd92   : > { %v1508_v13 = vadd.f32 1e-06, %v1504_v54  ;;  %v1505_v52 = vmul.f32 0.03125, %v1497_v51 }
 0xd93   : > { %v1500_v12 = vpop.xlane.xlu0 %1499 }
 0xd94   : > { %3882 = vrsqrt.f32 %v1508_v13  ;;  %v1509_v15 = vadd.f32 1e-06, %v1505_v52  ;;  %v1506_v53 = vmul.f32 0.03125, %v1500_v12 }
 0xd96   : > { %3884 = vrsqrt.f32 %v1509_v15  ;;  %v1510_v14 = vadd.f32 1e-06, %v1506_v53 }
 0xd97   : > { %v1503_v57 = vpop.xlane.xlu0 %1502 }
 0xd98   : > { %3886 = vrsqrt.f32 %v1510_v14  ;;  %v1507_v58 = vmul.f32 0.03125, %v1503_v57 }
 0xd9a   : > { %v1511_v59 = vadd.f32 1e-06, %v1507_v58 }
 0xd9c   : > { %3888 = vrsqrt.f32 %v1511_v59 }
 0xd9e   : > { %v3883_v55 = vpop.eup %3882 }
 0xd9f   : > { %v1516_v56 = vmul.f32 %v3883_v55, %v4332_v11 }
 0xda0   : > { %v3885_v60 = vpop.eup %3884 }
 0xda1   : > { %v1517_v63 = vmul.f32 %v3885_v60, %v4334_v38  ;;  %v1527_v1 = vmul.f32 %v3297_v61, %v1516_v56  ;;  %v3913_v60 = vld [vmem:[%s4638_s7 + $0x18] sm:$0xff] (!%p3312_p5)  }
 0xda2   : > { %v3887_v0 = vpop.eup %3886 }
 0xda3   : > { %v1528_v2 = vmul.f32 %v3297_v61, %v1517_v63  ;;  %v1518_v3 = vmul.f32 %v3887_v0, %v4330_v34  ;;  %v3915_v63 = vld [vmem:[%s4638_s7 + $0x30] sm:$0xff] (!%p3312_p5)  }
 0xda5   : > { %v1531_v5 = vpack.c.bf16 %v1528_v2, %v1527_v1  ;;  %v1529_v10 = vmul.f32 %v3297_v61, %v1518_v3  ;;  %v3916_v1 = vld [vmem:[%s4638_s7 + $0x28] sm:$0xff] (!%p3312_p5)   ;;  %v3917_v2 = vld [vmem:[%s4638_s7 + $0x38] sm:$0xff] (!%p3312_p5)   ;;  %v3918_v3 = vld [vmem:[%s4638_s7 + $0x40] sm:$0xff] (!%p3312_p5)  }
 0xda6   : > { %v3889_v6 = vpop.eup %3888 }
 0xda7   : > { %v1519_v9 = vmul.f32 %v3889_v6, %v4338_v41  ;;  %3621 = vmatprep.mubr.msk.bf16.mxu0 %vm4650_vm6, %v1531_v5  ;;  %v3919_v5 = vld [vmem:[%s4638_s7 + $0x50] sm:$0xff] (!%p3312_p5)   ;;  %v3920_v6 = vld [vmem:[%s4638_s7 + $0x48] sm:$0xff] (!%p3312_p5)   ;;  %vm4665_vm6 = vmmov (!%p3312_p5), %vm4663_vm0 }
 0xda9   : > { %v1530_v16 = vmul.f32 %v3297_v61, %v1519_v9  ;;  %v3914_v61 = vld [vmem:[%s4638_s7 + $0x20] sm:$0xff] (!%p3312_p5)   ;;  %v3921_v9 = vld [vmem:[%s4638_s7 + $0x58] sm:$0xff] (!%p3312_p5)  }
 0xdab   : > { %v1532_v17 = vpack.c.bf16 %v1530_v16, %v1529_v10  ;;  %v3922_v10 = vld [vmem:[%s4638_s7 + $0x60] sm:$0xff] (!%p3312_p5)   ;;  %v3923_v16 = vld [vmem:[%s4638_s7 + $0x70] sm:$0xff] (!%p3312_p5)  }
 0xdad   : > { %3622 = vmatmul.mubr.msk.bf16.vlgmr.msra.gmra.mrb[20].mxu0 %vm4651_vm5, %v1532_v17  ;;  %v3924_v17 = vld [vmem:[%s4638_s7 + $0x68] sm:$0xff] (!%p3312_p5)   ;;  %vm4666_vm5 = vmmov (!%p3312_p5), %vm4663_vm0 }
 0xe80   : > { %v3623_v22 = vpop.f32.mrb[20].mxu0 }
 0xe81   : > { %1640 = vrot.lane.b32.xlu1 %v3623_v22, %s4016_s16  ;;  %v1589_v23 = vpop.f32.mrb[21].mxu0  ;;  %v3304_v28 = vmul.f32 -1.442695, %v3623_v22 }
 0xe82   : > { %1636 = vrot.lane.b32.xlu0 %v1589_v23, %s4016_s16  ;;  %v3624_v24 = vpop.f32.mrb[22].mxu0  ;;  %v3302_v26 = vmul.f32 -1.442695, %v1589_v23 }
 0xe83   : > { %v1592_v25 = vpop.f32.mrb[23].mxu0  ;;  %v3305_v29 = vmul.f32 -1.442695, %v3624_v24 }
 0xe84   : > { %v3303_v27 = vmul.f32 -1.442695, %v1592_v25  ;;  %3890 = vpow2.f32 %v3302_v26  ;;  %v3933_v26 = vld [vmem:[%s4638_s7 + $0xb8] sm:$0xff] (!%p3312_p5)  }
 0xe85   : > { %1638 = vrot.lane.b32.xlu1 %v1592_v25, %s4016_s16 }
 0xe86   : > { %3892 = vpow2.f32 %v3303_v27  ;;  %v3934_v27 = vld [vmem:[%s4638_s7 + $0xc0] sm:$0xff] (!%p3312_p5)  }
 0xe87   : > { %3894 = vpow2.f32 %v3304_v28  ;;  %v3935_v28 = vld [vmem:[%s4638_s7 + $0xd0] sm:$0xff] (!%p3312_p5)  }
 0xe88   : > { %3896 = vpow2.f32 %v3305_v29  ;;  %v3936_v29 = vld [vmem:[%s4638_s7 + $0xc8] sm:$0xff] (!%p3312_p5)  }
 0xe89   : > { %1642 = vrot.lane.b32.xlu1 %v3624_v24, %s4016_s16 }
 0xe8e   : > { %v3891_v30 = vpop.eup %3890 }
 0xe8f   : > { %v1616_v32 = vadd.f32 1.0, %v3891_v30  ;;  %v3937_v30 = vld [vmem:[%s4638_s7 + $0xd8] sm:$0xff] (!%p3312_p5)  }
 0xe90   : > { %v3893_v31 = vpop.eup %3892 }
 0xe91   : > { %v3895_v33 = vpop.eup %3894  ;;  %v1617_v4 = vadd.f32 1.0, %v3893_v31  ;;  %3898 = vrcp.f32 %v1616_v32  ;;  %v4029_v31 = vmov (!%p3312_p5), 1966171168  }
 0xe92   : > { %v3897_v35 = vpop.eup %3896  ;;  %v1618_v36 = vadd.f32 1.0, %v3895_v33  ;;  %v1830_v32 = vunpack.c.l.s4 (!%p3312_p5), %v4029_v31 }
 0xe93   : > { %v1619_v8 = vadd.f32 1.0, %v3897_v35  ;;  %3900 = vrcp.f32 %v1617_v4 }
 0xe94   : > { %3902 = vrcp.f32 %v1618_v36  ;;  %v1831_v33 = vunpack.c.0.s8 (!%p3312_p5), %v1830_v32 }
 0xe95   : > { %3904 = vrcp.f32 %v1619_v8 }
 0xe96   : > { %v4525_v4 = vsub.s32 (!%p3312_p5), %v1831_v33, %v4176_v62 }
 0xe9b   : > { %v3899_v37 = vpop.eup %3898 }
 0xe9c   : > { %v1628_v44 = vmul.f32 %v3899_v37, %v1589_v23  ;;  %v3930_v23 = vld [vmem:[%s4638_s7 + $0xa0] sm:$0xff] (!%p3312_p5)  }
 0xe9d   : > { %v3901_v39 = vpop.eup %3900 }
 0xe9e   : > { %v3903_v42 = vpop.eup %3902  ;;  %v1629_v43 = vmul.f32 %v3901_v39, %v1592_v25  ;;  %v3932_v25 = vld [vmem:[%s4638_s7 + $0xa8] sm:$0xff] (!%p3312_p5)  }
 0xe9f   : > { %v3905_v45 = vpop.eup %3904  ;;  %v1630_v49 = vmul.f32 %v3903_v42, %v3623_v22  ;;  %v3929_v22 = vld [vmem:[%s4638_s7 + $0x98] sm:$0xff] (!%p3312_p5)  }
 0xea0   : > { %v1631_v54 = vmul.f32 %v3905_v45, %v3624_v24  ;;  %v3931_v24 = vld [vmem:[%s4638_s7 + $0xb0] sm:$0xff] (!%p3312_p5)  }
 0xef3   : > { %v1641_v40 = vpop.permute.xlu1 %1640 }
 0xef4   : > { %v1637_v7 = vpop.permute.xlu0 %1636  ;;  %v1650_v13 = vmul.f32 %v1641_v40, %v1630_v49 }
 0xef5   : > { %v1648_v47 = vmul.f32 %v1637_v7, %v1628_v44 }
 0xef7   : > { %v1639_v46 = vpop.permute.xlu1 %1638 }
 0xef8   : > { %v1649_v48 = vmul.f32 %v1639_v46, %v1629_v43  ;;  %v1756_v43 = vld [vmem:[%s4639_s8] sm:$0x1] (!%p3312_p5) }
 0xefa   : > { %v1652_v50 = vpack.c.bf16 %v1649_v48, %v1648_v47 }
 0xefb   : > { %v1643_v51 = vpop.permute.xlu1 %1642 }
 0xefc   : > { %v1651_v52 = vmul.f32 %v1643_v51, %v1631_v54  ;;  %3633 = vmatprep.mubr.msk.bf16.mxu1 %vm1686_vm2, %v1652_v50 }
 0xefe   : > { %v1653_v12 = vpack.c.bf16 %v1651_v52, %v1650_v13 }
 0xf00   : > { %3634 = vmatmul.mubr.msk.bf16.vlgmr.msra.gmra.mrb[20].mxu1 %vm1686_vm2, %v1653_v12  ;;  %vm4667_vm2 = vmmov (!%p3312_p5), %vm4663_vm0 }
 0xfd3   : > { %v3635_v15 = vpop.f32.mrb[20].mxu1  ;;  %1753 = sbr.rel (%p3312_p5) target bundleno = 4655 (0x122f), region = 64 }
 0xfd4   : > { %v1744_v53 = vadd.f32 %v3635_v15, %v4330_v34  ;;  %v1727_v14 = vpop.f32.mrb[21].mxu1  ;;  %v3910_v34 = vld [vmem:[%s4638_s7] sm:$0xff] (!%p3312_p5)  }
 0xfd5   : > { %v1742_v57 = vadd.f32 %v1727_v14, %v4332_v11  ;;  %v3636_v58 = vpop.f32.mrb[22].mxu1  ;;  %3637 = vmatprep.subr.bf16.mxu0 (!%p3312_p5), %v3910_v34 }
 0xfd6   : > { %1748 = vst.msk [vmem:[#allocation3 + $0x10] sm:$0xff] %vm4652_vm3, %v1744_v53  ;;  %v1745_v59 = vadd.f32 %v3636_v58, %v4338_v41  ;;  %v1730_v55 = vpop.f32.mrb[23].mxu1  ;;  %v3911_v41 = vld [vmem:[%s4638_s7 + $0x10] sm:$0xff] (!%p3312_p5)   ;;  %3638 = vmatpush3.bf16.msra.mxu0 (!%p3312_p5), %v3910_v34  ;;  %vm4668_vm3 = vmmov (!%p3312_p5), %vm4663_vm0 }
 0xfd7   : > { %1746 = vst.msk [vmem:[#allocation3] sm:$0xff] %vm4653_vm4, %v1742_v57  ;;  %v1743_v56 = vadd.f32 %v1730_v55, %v4334_v38  ;;  %v3912_v38 = vld [vmem:[%s4638_s7 + $0x8] sm:$0xff] (!%p3312_p5)   ;;  %3645 = vmatprep.subr.bf16.mxu1 (!%p3312_p5), %v3911_v41  ;;  %vm4669_vm4 = vmmov (!%p3312_p5), %vm4663_vm0 }
 0xfd8   : > { %1749 = vst.msk [vmem:[#allocation3 + $0x18] sm:$0xf] %vm4654_vm7, %v1745_v59  ;;  %3646 = vmatpush3.bf16.msra.mxu1 (!%p3312_p5), %v3911_v41  ;;  %3639 = vmatprep.subr.bf16.mxu0 (!%p3312_p5), %v3912_v38  ;;  %v4404_v0 = vpack.c.bf16 (!%p3312_p5), %v1745_v59, %v1744_v53  ;;  %vm4670_vm7 = vmmov (!%p3312_p5), %vm4663_vm0 }
 0xfd9   : > { %1747 = vst.msk [vmem:[#allocation3 + $0x8] sm:$0xff] %vm4655_vm8, %v1743_v56  ;;  %v4383_v11 = vpack.c.bf16 (!%p3312_p5), %v1743_v56, %v1742_v57  ;;  %3647 = vmatprep.subr.bf16.mxu1 (!%p3312_p5), %v3913_v60  ;;  %vm4671_vm8 = vmmov (!%p3312_p5), %vm4663_vm0 }
 0xfda   : > { %3640 = vmatpush3.bf16.msra.mxu0 %v3912_v38 }
 0xfdb   : > { %3641 = vmatprep.mubr.msk.bf16.mxu0 %vm4656_vm9, %v4383_v11  ;;  %3649 = vmatprep.mubr.msk.bf16.mxu1 %vm4657_vm10, %v4383_v11  ;;  %vm4672_vm9 = vmmov %vm4663_vm0 }
 0xfdc   : > { %3648 = vmatpush3.bf16.msra.mxu1 %v3913_v60  ;;  %3653 = vmatprep.subr.bf16.mxu0 %v3914_v61  ;;  %vm4673_vm10 = vmmov %vm4663_vm0 }
 0xfdd   : > { %3661 = vmatprep.subr.bf16.mxu1 %v3915_v63  ;;  %3642 = vmatmul.mubr.msk.bf16.vlgmr.msra.gmra.mrb[0].mxu0 %vm4658_vm11, %v4404_v0  ;;  %vm4674_vm11 = vmmov %vm4663_vm0 }
 0xfde   : > { %3654 = vmatpush3.bf16.msra.mxu0 %v3914_v61  ;;  %3657 = vmatprep.mubr.msk.bf16.mxu0 %vm4660_vm13, %v4383_v11  ;;  %vm4676_vm13 = vmmov %vm4663_vm0 }
 0xfdf   : > { %3650 = vmatmul.mubr.msk.bf16.vlgmr.msra.gmra.mrb[0].mxu1 %vm4659_vm12, %v4404_v0  ;;  %3655 = vmatprep.subr.bf16.mxu0 %v3916_v1  ;;  %vm4675_vm12 = vmmov %vm4663_vm0 }
 0xfe0   : > { %3662 = vmatpush3.bf16.msra.mxu1 %v3915_v63  ;;  %3665 = vmatprep.mubr.msk.bf16.mxu1 %vm4661_vm14, %v4383_v11  ;;  %vm4677_vm14 = vmmov %vm4663_vm0 }
 0xfe1   : > { %3663 = vmatprep.subr.bf16.mxu1 %v3917_v2 }
 0xfe2   : > { %3656 = vmatpush3.bf16.msra.mxu0 %v3916_v1 }
 0xfe3   : > { %3669 = vmatprep.subr.bf16.mxu0 %v3918_v3 }
 0xfe4   : > { %3664 = vmatpush3.bf16.msra.mxu1 %v3917_v2 }
 0xfe5   : > { %3677 = vmatprep.subr.bf16.mxu1 %v3919_v5  ;;  %3658 = vmatmul.mubr.msk.bf16.vlgmr.msra.gmra.mrb[4].mxu0 %vm4662_vm15, %v4404_v0  ;;  %vm4678_vm15 = vmmov %vm4663_vm0 }
 0xfe6   : > { %3670 = vmatpush3.bf16.msra.mxu0 %v3918_v3  ;;  %3673 = vmatprep.mubr.msk.bf16.mxu0 %vm4664_vm1, %v4383_v11  ;;  %vm4679_vm1 = vmmov %vm4663_vm0 }
 0xfe7   : > { %3666 = vmatmul.mubr.msk.bf16.vlgmr.msra.gmra.mrb[4].mxu1 %vm4663_vm0, %v4404_v0  ;;  %3671 = vmatprep.subr.bf16.mxu0 %v3920_v6 }
 0xfe8   : > { %3678 = vmatpush3.bf16.msra.mxu1 %v3919_v5  ;;  %3681 = vmatprep.mubr.msk.bf16.mxu1 %vm4665_vm6, %v4383_v11  ;;  %vm4680_vm6 = vmmov %vm4663_vm0 }
 0xfe9   : > { %3679 = vmatprep.subr.bf16.mxu1 %v3921_v9 }
 0xfea   : > { %3672 = vmatpush3.bf16.msra.mxu0 %v3920_v6 }
 0xfeb   : > { %3685 = vmatprep.subr.bf16.mxu0 %v3922_v10 }
 0xfec   : > { %3680 = vmatpush3.bf16.msra.mxu1 %v3921_v9 }
 0xfed   : > { %3693 = vmatprep.subr.bf16.mxu1 %v3923_v16  ;;  %3674 = vmatmul.mubr.msk.bf16.vlgmr.msra.gmra.mrb[8].mxu0 %vm4666_vm5, %v4404_v0  ;;  %vm4681_vm5 = vmmov %vm4663_vm0 }
 0xfee   : > { %3686 = vmatpush3.bf16.msra.mxu0 %v3922_v10  ;;  %3689 = vmatprep.mubr.msk.bf16.mxu0 %vm4668_vm3, %v4383_v11  ;;  %vm3110_vm3 = vcmask 1040384  }
 0xfef   : > { %3682 = vmatmul.mubr.msk.bf16.vlgmr.msra.gmra.mrb[8].mxu1 %vm4667_vm2, %v4404_v0  ;;  %3687 = vmatprep.subr.bf16.mxu0 %v3924_v17  ;;  %vm4682_vm2 = vmmov %vm4663_vm0 }
 0xff0   : > { %3694 = vmatpush3.bf16.msra.mxu1 %v3923_v16  ;;  %3697 = vmatprep.mubr.msk.bf16.mxu1 %vm4669_vm4, %v4383_v11 }
 0xff1   : > { %3695 = vmatprep.subr.bf16.mxu1 %v3925_v18 }
 0xff2   : > { %3688 = vmatpush3.bf16.msra.mxu0 %v3924_v17 }
 0xff3   : > { %3701 = vmatprep.subr.bf16.mxu0 %v3926_v19 }
 0xff4   : > { %3696 = vmatpush3.bf16.msra.mxu1 %v3925_v18 }
 0xff5   : > { %3709 = vmatprep.subr.bf16.mxu1 %v3927_v20  ;;  %3690 = vmatmul.mubr.msk.bf16.vlgmr.msra.gmra.mrb[12].mxu0 %vm4670_vm7, %v4404_v0 }
 0xff6   : > { %3702 = vmatpush3.bf16.msra.mxu0 %v3926_v19  ;;  %3705 = vmatprep.mubr.msk.bf16.mxu0 %vm4672_vm9, %v4383_v11 }
 0xff7   : > { %3698 = vmatmul.mubr.msk.bf16.vlgmr.msra.gmra.mrb[12].mxu1 %vm4671_vm8, %v4404_v0  ;;  %3703 = vmatprep.subr.bf16.mxu0 %v3928_v21 }
 0xff8   : > { %3710 = vmatpush3.bf16.msra.mxu1 %v3927_v20  ;;  %3713 = vmatprep.mubr.msk.bf16.mxu1 %vm4673_vm10, %v4383_v11 }
 0xff9   : > { %3711 = vmatprep.subr.bf16.mxu1 %v3929_v22 }
 0xffa   : > { %3704 = vmatpush3.bf16.msra.mxu0 %v3928_v21 }
 0xffb   : > { %3717 = vmatprep.subr.bf16.mxu0 %v3930_v23 }
 0xffc   : > { %3712 = vmatpush3.bf16.msra.mxu1 %v3929_v22 }
 0xffd   : > { %3725 = vmatprep.subr.bf16.mxu1 %v3931_v24  ;;  %3706 = vmatmul.mubr.msk.bf16.vlgmr.msra.gmra.mrb[16].mxu0 %vm4674_vm11, %v4404_v0 }
 0xffe   : > { %3718 = vmatpush3.bf16.msra.mxu0 %v3930_v23  ;;  %3721 = vmatprep.mubr.msk.bf16.mxu0 %vm4676_vm13, %v4383_v11 }
 0xfff   : > { %3714 = vmatmul.mubr.msk.bf16.vlgmr.msra.gmra.mrb[16].mxu1 %vm4675_vm12, %v4404_v0  ;;  %3719 = vmatprep.subr.bf16.mxu0 %v3932_v25 }
0x1000   : > { %3726 = vmatpush3.bf16.msra.mxu1 %v3931_v24  ;;  %3729 = vmatprep.mubr.msk.bf16.mxu1 %vm4677_vm14, %v4383_v11 }
0x1001   : > { %3727 = vmatprep.subr.bf16.mxu1 %v3933_v26 }
0x1002   : > { %3720 = vmatpush3.bf16.msra.mxu0 %v3932_v25 }
0x1003   : > { %3733 = vmatprep.subr.bf16.mxu0 %v3934_v27 }
0x1004   : > { %3728 = vmatpush3.bf16.msra.mxu1 %v3933_v26 }
0x1005   : > { %3741 = vmatprep.subr.bf16.mxu1 %v3935_v28  ;;  %3722 = vmatmul.mubr.msk.bf16.vlgmr.msra.gmra.mrb[20].mxu0 %vm4678_vm15, %v4404_v0 }
0x1006   : > { %3734 = vmatpush3.bf16.msra.mxu0 %v3934_v27  ;;  %3737 = vmatprep.mubr.msk.bf16.mxu0 %vm4679_vm1, %v4383_v11 }
0x1007   : > { %3730 = vmatmul.mubr.msk.bf16.vlgmr.msra.gmra.mrb[20].mxu1 %vm4663_vm0, %v4404_v0  ;;  %3735 = vmatprep.subr.bf16.mxu0 %v3936_v29 }
0x1008   : > { %3742 = vmatpush3.bf16.msra.mxu1 %v3935_v28  ;;  %3745 = vmatprep.mubr.msk.bf16.mxu1 %vm4680_vm6, %v4383_v11 }
0x1009   : > { %3743 = vmatprep.subr.bf16.mxu1 %v3937_v30 }
0x100a   : > { %3736 = vmatpush3.bf16.msra.mxu0 %v3936_v29 }
0x100c   : > { %3744 = vmatpush3.bf16.msra.mxu1 %v3937_v30 }
0x100d   : > { %3738 = vmatmul.mubr.msk.bf16.vlgmr.msra.gmra.mrb[24].mxu0 %vm4681_vm5, %v4404_v0 }
0x100f   : > { %3746 = vmatmul.mubr.msk.bf16.vlgmr.msra.gmra.mrb[24].mxu1 %vm4682_vm2, %v4404_v0 }
0x10b0   : > { %v3643_v35 = vpop.f32.mrb[0].mxu0 }
0x10b1   : > { %v1813_v8 = vpop.f32.mrb[1].mxu0 }
0x10b2   : > { %v3651_v36 = vpop.f32.mrb[0].mxu1  ;;  %v3644_v39 = vpop.f32.mrb[2].mxu0  ;;  %v1826_v48 = vadd.f32 %v1813_v8, %v1756_v43 }
0x10b3   : > { %v1897_v37 = vpop.f32.mrb[1].mxu1  ;;  %v1816_v42 = vpop.f32.mrb[3].mxu0 }
0x10b4   : > { %v1917_v40 = vrot.slane %v1897_v37, %v4525_v4  ;;  %v3652_v7 = vpop.f32.mrb[2].mxu1  ;;  %v1828_v44 = vcombine.high %v1816_v42, %v1816_v42 }
0x10b5   : > { %v1900_v45 = vpop.f32.mrb[3].mxu1 }
0x10b6   : > { %v1918_v46 = vcombine.high %v1917_v40, %v1917_v40  ;;  %v1929_v47 = vcombine.high %v1900_v45, %v1900_v45  ;;  %v1835_v62 = vrot.slane %v1828_v44, %v4525_v4 }
0x10b8   : > { %v1925_v49 = vrot.slane %v1918_v46, %v4525_v4  ;;  %v1936_v50 = vrot.slane %v1929_v47, %v4525_v4  ;;  %v1842_v54 = vrot.slane %v1835_v62, %v4525_v4  ;;  %v3659_v51 = vpop.f32.mrb[4].mxu0 }
0x10b9   : > { %v1999_v15 = vpop.f32.mrb[5].mxu0 }
0x10ba   : > { %v1927_v13 = vadd.f32 %v1925_v49, %v1826_v48  ;;  %v1937_v52 = vcombine.high %v1936_v50, %v1936_v50  ;;  %v3667_v12 = vpop.f32.mrb[4].mxu1  ;;  %v1843_v53 = vcombine.high %v1842_v54, %v1842_v54  ;;  %v2019_v57 = vrot.slane %v1999_v15, %v4525_v4  ;;  %v3660_v59 = vpop.f32.mrb[6].mxu0 }
0x10bb   : > { %v2121_v14 = vrot.slane %v3667_v12, %v4525_v4  ;;  %v2082_v58 = vpop.f32.mrb[5].mxu1  ;;  %v2002_v11 = vpop.f32.mrb[7].mxu0 }
0x10bc   : > { %v1944_v55 = vrot.slane %v1937_v52, %v4525_v4  ;;  %v2102_v56 = vrot.slane %v2082_v58, %v4525_v4  ;;  %v3668_v34 = vpop.f32.mrb[6].mxu1  ;;  %v1845_v41 = vadd.f32 %v1843_v53, %v1756_v43  ;;  %v2026_v38 = vrot.slane %v2019_v57, %v4525_v4 }
0x10bd   : > { %v2085_v60 = vpop.f32.mrb[7].mxu1  ;;  %v2122_v63 = vcombine.high %v2121_v14, %v2121_v14 }
0x10be   : > { %v1945_v61 = vcombine.high %v1944_v55, %v1944_v55  ;;  %v2103_v0 = vcombine.high %v2102_v56, %v2102_v56  ;;  %v2027_v1 = vcombine.high %v2026_v38, %v2026_v38 }
0x10bf   : > { %v2129_v10 = vrot.slane %v2122_v63, %v4525_v4 }
0x10c0   : > { %v1947_v2 = vadd.f32 %v1945_v61, %v1845_v41  ;;  %v2110_v3 = vrot.slane %v2103_v0, %v4525_v4  ;;  %v2029_v5 = vadd.f32 %v2027_v1, %v1927_v13  ;;  %v3675_v6 = vpop.f32.mrb[8].mxu0 }
0x10c1   : > { %v2221_v17 = vrot.slane %v3675_v6, %v4525_v4  ;;  %v2183_v19 = vpop.f32.mrb[9].mxu0 }
0x10c2   : > { %v2030_v9 = vadd.f32 %v3659_v51, %v1947_v2  ;;  %v2111_v16 = vcombine.high %v2110_v3, %v2110_v3  ;;  %v3683_v18 = vpop.f32.mrb[8].mxu1  ;;  %v2197_v21 = vcombine.high %v2183_v19, %v2183_v19  ;;  %v3676_v23 = vpop.f32.mrb[10].mxu0 }
0x10c3   : > { %v2322_v20 = vrot.slane %v3683_v18, %v4525_v4  ;;  %v2283_v22 = vpop.f32.mrb[9].mxu1  ;;  %v2228_v26 = vrot.slane %v2221_v17, %v4525_v4  ;;  %v2186_v29 = vpop.f32.mrb[11].mxu0 }
0x10c4   : > { %v2131_v24 = vadd.f32 %v2129_v10, %v2030_v9  ;;  %v2113_v25 = vadd.f32 %v2111_v16, %v2029_v5  ;;  %v2297_v27 = vcombine.high %v2283_v22, %v2283_v22  ;;  %v3684_v28 = vpop.f32.mrb[10].mxu1  ;;  %v2204_v31 = vrot.slane %v2197_v21, %v4525_v4 }
0x10c5   : > { %v2323_v30 = vcombine.high %v2322_v20, %v2322_v20  ;;  %v2286_v32 = vpop.f32.mrb[11].mxu1  ;;  %v2229_v33 = vcombine.high %v2228_v26, %v2228_v26 }
0x10c6   : > { %v2304_v35 = vrot.slane %v2297_v27, %v4525_v4  ;;  %v2211_v8 = vrot.slane %v2204_v31, %v4525_v4 }
0x10c7   : > { %v2330_v36 = vrot.slane %v2323_v30, %v4525_v4  ;;  %v2231_v37 = vadd.f32 %v2229_v33, %v2131_v24 }
0x10c8   : > { %v2305_v39 = vcombine.high %v2304_v35, %v2304_v35  ;;  %v2213_v7 = vadd.f32 %v2211_v8, %v2113_v25  ;;  %v3691_v42 = vpop.f32.mrb[12].mxu0 }
0x10c9   : > { %v2331_v40 = vcombine.high %v2330_v36, %v2330_v36  ;;  %v2418_v44 = vcombine.high %v3691_v42, %v3691_v42  ;;  %v2385_v46 = vpop.f32.mrb[13].mxu0 }
0x10ca   : > { %v2312_v43 = vrot.slane %v2305_v39, %v4525_v4  ;;  %v3699_v45 = vpop.f32.mrb[12].mxu1  ;;  %v2399_v48 = vcombine.high %v2385_v46, %v2385_v46  ;;  %v3692_v50 = vpop.f32.mrb[14].mxu0 }
0x10cb   : > { %v2333_v47 = vadd.f32 %v2331_v40, %v2231_v37  ;;  %v2520_v62 = vcombine.high %v3699_v45, %v3699_v45  ;;  %v2486_v49 = vpop.f32.mrb[13].mxu1  ;;  %v2425_v54 = vrot.slane %v2418_v44, %v4525_v4  ;;  %v2388_v52 = vpop.f32.mrb[15].mxu0 }
0x10cc   : > { %v2500_v51 = vcombine.high %v2486_v49, %v2486_v49  ;;  %v3700_v13 = vpop.f32.mrb[14].mxu1  ;;  %v2314_v12 = vadd.f32 %v2312_v43, %v2213_v7  ;;  %v2406_v53 = vrot.slane %v2399_v48, %v4525_v4 }
0x10cd   : > { %v2527_v15 = vrot.slane %v2520_v62, %v4525_v4  ;;  %v2489_v14 = vpop.f32.mrb[15].mxu1  ;;  %v2432_v57 = vrot.slane %v2425_v54, %v4525_v4 }
0x10ce   : > { %v2507_v58 = vrot.slane %v2500_v51, %v4525_v4  ;;  %v2413_v55 = vrot.slane %v2406_v53, %v4525_v4 }
0x10cf   : > { %v2528_v59 = vcombine.high %v2527_v15, %v2527_v15  ;;  %v2434_v56 = vadd.f32 %v2432_v57, %v2333_v47 }
0x10d0   : > { %v2508_v34 = vcombine.high %v2507_v58, %v2507_v58  ;;  %v2414_v41 = vcombine.high %v2413_v55, %v2413_v55  ;;  %v3707_v38 = vpop.f32.mrb[16].mxu0 }
0x10d1   : > { %v2535_v11 = vrot.slane %v2528_v59, %v4525_v4  ;;  %v2604_v60 = vcombine.high %v3707_v38, %v3707_v38  ;;  %v2589_v63 = vpop.f32.mrb[17].mxu0 }
0x10d2   : > { %v3715_v61 = vpop.f32.mrb[16].mxu1  ;;  %v2515_v0 = vrot.slane %v2508_v34, %v4525_v4  ;;  %v3708_v3 = vpop.f32.mrb[18].mxu0  ;;  %v2416_v5 = vadd.f32 %v2414_v41, %v2314_v12 }
0x10d3   : > { %v2705_v1 = vcombine.high %v3715_v61, %v3715_v61  ;;  %v2673_v2 = vpop.f32.mrb[17].mxu1  ;;  %v2537_v6 = vadd.f32 %v2535_v11, %v2434_v56  ;;  %v2611_v9 = vrot.slane %v2604_v60, %v4525_v4  ;;  %v2591_v17 = vpop.f32.mrb[19].mxu0 }
0x10d4   : > { %v3716_v10 = vpop.f32.mrb[18].mxu1  ;;  %v2516_v16 = vcombine.high %v2515_v0, %v2515_v0 }
0x10d5   : > { %v2712_v18 = vrot.slane %v2705_v1, %v4525_v4  ;;  %v2675_v19 = vpop.f32.mrb[19].mxu1  ;;  %v2618_v20 = vrot.slane %v2611_v9, %v4525_v4 }
0x10d6   : > { %v2518_v21 = vadd.f32 %v2516_v16, %v2416_v5  ;;  %v2693_v22 = vrot.slane %v2675_v19, %v4525_v4 }
0x10d7   : > { %v2713_v23 = vcombine.high %v2712_v18, %v2712_v18  ;;  %v2619_v24 = vcombine.high %v2618_v20, %v2618_v20 }
0x10d8   : > { %v2602_v25 = vadd.f32 %v2591_v17, %v2518_v21  ;;  %v2694_v26 = vcombine.high %v2693_v22, %v2693_v22  ;;  %v3723_v27 = vpop.f32.mrb[20].mxu0 }
0x10d9   : > { %v2720_v28 = vrot.slane %v2713_v23, %v4525_v4  ;;  %v2775_v31 = vpop.f32.mrb[21].mxu0  ;;  %v2621_v32 = vadd.f32 %v2619_v24, %v2537_v6 }
0x10da   : > { %v2701_v29 = vrot.slane %v2694_v26, %v4525_v4  ;;  %v3731_v30 = vpop.f32.mrb[20].mxu1  ;;  %v3724_v36 = vpop.f32.mrb[22].mxu0 }
0x10db   : > { %v2858_v33 = vpop.f32.mrb[21].mxu1  ;;  %v2721_v35 = vcombine.high %v2720_v28, %v2720_v28  ;;  %v2777_v39 = vpop.f32.mrb[23].mxu0 }
0x10dc   : > { %v2703_v8 = vadd.f32 %v2701_v29, %v2602_v25  ;;  %v3732_v37 = vpop.f32.mrb[22].mxu1  ;;  %v2795_v42 = vrot.slane %v2777_v39, %v4525_v4 }
0x10dd   : > { %v2723_v40 = vadd.f32 %v2721_v35, %v2621_v32  ;;  %v2897_v7 = vrot.slane %v3732_v37, %v4525_v4  ;;  %v2860_v43 = vpop.f32.mrb[23].mxu1 }
0x10de   : > { %v2878_v44 = vrot.slane %v2860_v43, %v4525_v4  ;;  %v2802_v47 = vrot.slane %v2795_v42, %v4525_v4 }
0x10df   : > { %v2806_v45 = vadd.f32 %v3724_v36, %v2723_v40  ;;  %v2898_v46 = vcombine.high %v2897_v7, %v2897_v7 }
0x10e0   : > { %v2879_v62 = vcombine.high %v2878_v44, %v2878_v44  ;;  %v2803_v49 = vcombine.high %v2802_v47, %v2802_v47  ;;  %v3739_v50 = vpop.f32.mrb[24].mxu0 }
0x10e1   : > { %v2905_v48 = vrot.slane %v2898_v46, %v4525_v4  ;;  %v2959_v13 = vpop.f32.mrb[25].mxu0 }
0x10e2   : > { %v2886_v54 = vrot.slane %v2879_v62, %v4525_v4  ;;  %v3747_v51 = vpop.f32.mrb[24].mxu1  ;;  %v2805_v12 = vadd.f32 %v2803_v49, %v2703_v8  ;;  %v3740_v53 = vpop.f32.mrb[26].mxu0 }
0x10e3   : > { %v2907_v52 = vadd.f32 %v2905_v48, %v2806_v45  ;;  %v3059_v15 = vpop.f32.mrb[25].mxu1  ;;  %v2997_v57 = vrot.slane %v3740_v53, %v4525_v4  ;;  %v2961_v59 = vpop.f32.mrb[27].mxu0 }
0x10e4   : > { %v2887_v14 = vcombine.high %v2886_v54, %v2886_v54  ;;  %v3748_v58 = vpop.f32.mrb[26].mxu1  ;;  %v2973_v56 = vcombine.high %v2961_v59, %v2961_v59 }
0x10e5   : > { %v3098_v55 = vrot.slane %v3748_v58, %v4525_v4  ;;  %v3061_v34 = vpop.f32.mrb[27].mxu1  ;;  %v3004_v41 = vrot.slane %v2997_v57, %v4525_v4 }
0x10e6   : > { %v2889_v11 = vadd.f32 %v2887_v14, %v2805_v12  ;;  %v3073_v38 = vcombine.high %v3061_v34, %v3061_v34  ;;  %v2980_v61 = vrot.slane %v2973_v56, %v4525_v4 }
0x10e7   : > { %v3099_v60 = vcombine.high %v3098_v55, %v3098_v55  ;;  %v3005_v63 = vcombine.high %v3004_v41, %v3004_v41 }
0x10e8   : > { %v3080_v0 = vrot.slane %v3073_v38, %v4525_v4  ;;  %v2987_v2 = vrot.slane %v2980_v61, %v4525_v4 }
0x10e9   : > { %v3106_v1 = vrot.slane %v3099_v60, %v4525_v4  ;;  %v3007_v5 = vadd.f32 %v3005_v63, %v2907_v52 }
0x10ea   : > { %v3081_v3 = vcombine.high %v3080_v0, %v3080_v0  ;;  %v2989_v9 = vadd.f32 %v2987_v2, %v2889_v11 }
0x10eb   : > { %v3107_v6 = vcombine.high %v3106_v1, %v3106_v1 }
0x10ec   : > { %v3088_v10 = vrot.slane %v3081_v3, %v4525_v4 }
0x10ed   : > { %v3109_v16 = vadd.f32 %v3107_v6, %v3007_v5 }
0x10ee   : > { %v3090_v17 = vadd.f32 %v3088_v10, %v2989_v9 }
0x10ef   : > { %v3123_v19 = vsel %vm3110_vm3, %v3109_v16, -inf }
0x10f0   : > { %v3111_v18 = vsel %vm3110_vm3, %v3090_v17, -inf }
0x10f1   : > { %3112 = vmax.xlane.f32.xlu0 %v3111_v18 }
0x10f5   : > { %3124 = vmax.xlane.f32.xlu0 %v3123_v19 }
0x117e   : > { %v3113_v20 = vpop.xlane.xlu0 %3112 }
0x117f   : > { %v3114_v21 = vsub.f32 %v3090_v17, %v3113_v20 }
0x1181   : > { %v3115_v22 = vmul.f32 1.442695, %v3114_v21 }
0x1182   : > { %v3125_v23 = vpop.xlane.xlu0 %3124 }
0x1183   : > { %3938 = vpow2.f32 %v3115_v22  ;;  %v3126_v24 = vsub.f32 %v3109_v16, %v3125_v23 }
0x1185   : > { %v3127_v25 = vmul.f32 1.442695, %v3126_v24 }
0x1187   : > { %3940 = vpow2.f32 %v3127_v25 }
0x118d   : > { %v3939_v26 = vpop.eup %3938 }
0x118e   : > { %v3117_v4 = vsel %vm3110_vm3, %v3939_v26, 0.0 }
0x118f   : > { %3118 = vadd.xlane.f32.xlu1 %v3117_v4 }
0x1191   : > { %v3941_v27 = vpop.eup %3940 }
0x1192   : > { %v3129_v28 = vsel %vm3110_vm3, %v3941_v27, 0.0 }
0x1193   : > { %3130 = vadd.xlane.f32.xlu1 %v3129_v28 }
0x121c   : > { %v3119_v29 = vpop.xlane.xlu1 %3118 }
0x121d   : > { %3942 = vrcp.f32 %v3119_v29 }
0x1220   : > { %v3131_v30 = vpop.xlane.xlu1 %3130 }
0x1221   : > { %3944 = vrcp.f32 %v3131_v30 }
0x1227   : > { %v3943_v31 = vpop.eup %3942 }
0x1228   : > { %v3121_v32 = vmul.f32 %v3943_v31, %v3939_v26 }
0x122a   : > { %3122 = vst [vmem:[#allocation5] sm:$0x1] %v3121_v32 }
0x122b   : > { %v3945_v33 = vpop.eup %3944 }
0x122c   : > { %v3133_v35 = vmul.f32 %v3945_v33, %v3941_v27 }
0x122e   : > { %3134 = vst [vmem:[#allocation5 + $0x1] sm:$0x1] %v3133_v35 }
0x122f PF: > { %p3769_p6 = scmp.eq.s32.totalorder %s4094_s14, 1  ;;  %s4030_s24 = smov [#allocation3]  }
0x1230   : > { %s3141_s26 = sshll.u32 %s4030_s24, 4  ;;  %s3142_s26 = int_to_ptr.vmem [resolvable:$true] %s3141_s26 }
0x1231   : > { %s3946_s19 = scalar_lea.vmem %s3142_s26, 512  ;;  %p3953_p10 = scmp.lt.s32.totalorder %s3142_s26, %s3142_s26 }
0x1232   : > { %p3947_p7 = scmp.ne.s32.totalorder %s3142_s26, %s3946_s19  ;;  %p3954_p11 = scmp.lt.s32.totalorder %s3946_s19, %s3946_s19 }
0x1234   : > { %p3948_p8 = pnand %p3947_p7, %p3769_p6  ;;  %p3955_p12 = por %p3954_p11, %p3953_p10 }
0x1236   : > { %p3949_p9 = pneg %p3948_p8 }
0x1238   : > { %p3956_p13 = pnand %p3955_p12, %p3949_p9 }
0x123a   : > { %3959 = shalt.err (!%p3956_p13)
}
0x123b   : > { %s3960_s30 = scalar_lea.hbm %s4640_s9, 512 }
0x123c   : > { %p3961_p0 = scmp.ne.s32.totalorder %s4640_s9, %s3960_s30  ;;  %p3966_p3 = scmp.lt.u32.totalorder %s3960_s30, %s4640_s9 }
0x123e   : > { %p3962_p1 = pnand %p3961_p0, %p3769_p6 }
0x1240   : > { %p3963_p2 = pneg %p3962_p1 }
0x1242   : > { %p3968_p4 = pnand %p3966_p3, %p3963_p2 }
0x1244   : > { %3971 = shalt.err (!%p3968_p4)
}
0x1245   : > { %s4031_s15 = smov 128   ;;  %s4032_s16 = smov [#allocation5]  }
0x1246   : > { %3762 = dma.vmem_to_hbm [thread:$0]  (%p3769_p6), %s3142_s26, 512, %s4640_s9, [#allocation4], %s4031_s15, %s4031_s15, %s4026_s22  }
0x1247   : > { %s3155_s17 = sshll.u32 %s4032_s16, 4  ;;  %s3156_s17 = int_to_ptr.vmem [resolvable:$true] %s3155_s17 }
0x1248   : > { %s3972_s21 = scalar_lea.vmem %s3156_s17, 32  ;;  %p3979_p9 = scmp.lt.s32.totalorder %s3156_s17, %s3156_s17 }
0x1249   : > { %p3973_p5 = scmp.ne.s32.totalorder %s3156_s17, %s3972_s21  ;;  %p3980_p10 = scmp.lt.s32.totalorder %s3972_s21, %s3972_s21 }
0x124b   : > { %p3974_p7 = pnand %p3973_p5, %p3769_p6  ;;  %p3981_p11 = por %p3980_p10, %p3979_p9 }
0x124d   : > { %p3975_p8 = pneg %p3974_p7 }
0x124f   : > { %p3982_p12 = pnand %p3981_p11, %p3975_p8 }
0x1251   : > { %3985 = shalt.err (!%p3982_p12)
}
0x1252   : > { %s3986_s19 = scalar_lea.hbm %s4641_s10, 32 }
0x1253   : > { %p3987_p13 = scmp.ne.s32.totalorder %s4641_s10, %s3986_s19  ;;  %p3992_p2 = scmp.lt.u32.totalorder %s3986_s19, %s4641_s10 }
0x1255   : > { %p3988_p0 = pnand %p3987_p13, %p3769_p6 }
0x1257   : > { %p3989_p1 = pneg %p3988_p0 }
0x1259   : > { %p3994_p3 = pnand %p3992_p2, %p3989_p1 }
0x125b   : > { %3997 = shalt.err (!%p3994_p3)
}
0x125c   : > { %3764 = dma.vmem_to_hbm [thread:$0]  (%p3769_p6), %s3156_s17, 32, %s4641_s10, [#allocation6]  }
0x125d   : > { %4003 = dma.done.wait (%p3769_p6), [#allocation4], 512  }
0x125e   : > { %4005 = vsyncadd (%p3769_p6), [#allocation4], 4294966784 }
0x125f   : > { %4007 = dma.done.wait (%p3769_p6), [#allocation6], 32  }
0x1260   : > { %4009 = vsyncadd (%p3769_p6), [#allocation6], 4294967264 }
0x1261 PF: > { %s23_s13 = sadd.s32 1, %s4012_s13  }
0x1262   : > { %p20_p4 = scmp.ge.s32.totalorder %s23_s13, 4  }
0x1264   :  { %22 = sbr.rel (!%p20_p4) target bundleno = 2 (0x2), region = 127 }
0x126b   :  { %3172 = vsyncpa [#allocation4], 1 }
0x126c   :  { %3174 = vsyncpa [#allocation4 + $0x1], 1 }
0x126d   :  { %3175 = vsyncpa [#allocation6], 1 }

</bundles_post_ra>
